<compile_context>
chip_gen: v7x
topology: tpu7x:2x2x1
jax: 0.10.0
libtpu: 0.0.40
codegen_flags: <defaults>
</compile_context>

<pallas_src>
import functools
import math

import jax
import jax.numpy as jnp
from jax import lax
from jax.experimental import pallas as pl
from jax.experimental.pallas import tpu as pltpu


def _erf_f32(x):
    # f32 erf rational approximation: erf(x) ~= x * P(x^2) / Q(x^2) with the
    # input clamped to [-4, 4].  Coefficients are the XLA / Eigen ErfImpl32
    # constants, i.e. the same numerics torch's exact GELU path uses on TPU.
    alpha = (-2.72614225801306e-10, 2.77068142495902e-08, -2.10102402082508e-06,
             -5.69250639462346e-05, -7.34990630326855e-04, -2.954600054904e-03,
             -1.60960333262415e-02)
    beta = (-1.45660718464996e-05, -2.13374055278905e-04, -1.68282697438203e-03,
            -7.37332916720468e-03, -1.42647390514189e-02)
    x = jnp.clip(x, -4.0, 4.0)
    x2 = x * x
    p = jnp.full_like(x, alpha[0])
    for c in alpha[1:]:
        p = p * x2 + c
    q = jnp.full_like(x, beta[0])
    for c in beta[1:]:
        q = q * x2 + c
    return x * p / q


def _gelu_exact(x):
    # torch.nn.functional.gelu default: exact (erf-based) GELU, kept in f32.
    # TODO(synk): on v6e/v7x the polynomial could run in bf16 (2 elems/lane) or
    # be swapped for tanh-approx (EUP slot); kept exact f32 for v5e + parity.
    return 0.5 * x * (1.0 + _erf_f32(x * (1.0 / math.sqrt(2.0))))


def _layernorm(x, gamma, beta, eps=1e-6):
    # torch LayerNorm(eps=1e-6); single-pass stats: var = E[x^2] - E[x]^2.
    mu = jnp.mean(x, axis=-1, keepdims=True)
    ms = jnp.mean(x * x, axis=-1, keepdims=True)
    var = jnp.maximum(ms - mu * mu, 0.0)
    return (x - mu) * lax.rsqrt(var + eps) * gamma + beta


def _encoder_kernel(x_ref, mask_ref,
                    wqkv_ref, bqkv_ref, wo_ref, bo_ref,
                    ln1g_ref, ln1b_ref, ln2g_ref, ln2b_ref,
                    w1_ref, b1_ref, w2_ref, b2_ref,
                    encg_ref, encb_ref,
                    out_ref, *, num_heads, batch_tile):
    layer = pl.program_id(1)
    n_layers = pl.num_programs(1)
    f32 = jnp.float32
    bf16 = jnp.bfloat16

    H = out_ref.shape[-1]
    hd = H // num_heads                       # attention_head_size
    scale = 1.0 / math.sqrt(hd)

    # out_ref doubles as the persistent VMEM-resident residual stream for the
    # whole batch tile: its block index depends only on the batch-chunk axis
    # and the layer axis varies fastest, so the block stays resident across
    # all L layer steps of a chunk.
    @pl.when(layer == 0)
    def _():
        out_ref[...] = x_ref[...]

    key_mask = mask_ref[...]                  # (1, S) additive mask (0 / -1e30)

    def sample_body(bi, carry):
        x = out_ref[bi]                       # (S, H) residual stream, f32

        # ------------------ Attention sub-block (pre-LN) ------------------
        xn = _layernorm(x, ln1g_ref[0], ln1b_ref[0]).astype(bf16)
        qkv = jnp.dot(xn, wqkv_ref[0], preferred_element_type=f32) + bqkv_ref[0]
        q = (qkv[:, :H] * scale).astype(bf16)     # fold 1/sqrt(hd) into q once
        k = qkv[:, H:2 * H].astype(bf16)
        v = qkv[:, 2 * H:].astype(bf16)

        attn = jnp.zeros(x.shape, f32)
        # TODO(synk): for large num_heads a fori_loop over heads would bound
        # vreg live ranges; kept as a static loop because dynamic lane-dim
        # slicing is not reliably supported by Mosaic.
        for h in range(num_heads):
            c0, c1 = h * hd, (h + 1) * hd
            # q @ k^T without an explicit transpose (contract the head dim).
            sc = lax.dot_general(q[:, c0:c1], k[:, c0:c1],
                                 (((1,), (1,)), ((), ())),
                                 preferred_element_type=f32)
            sc = sc + key_mask                # mask padded key positions
            sc = sc - jnp.max(sc, axis=-1, keepdims=True)
            p = jnp.exp(sc)
            inv = 1.0 / jnp.sum(p, axis=-1, keepdims=True)   # softmax(dim=-1)
            ctx = jnp.dot((p * inv).astype(bf16), v[:, c0:c1],
                          preferred_element_type=f32)
            # Fold this head's slice of the output projection directly into
            # the f32 accumulator (no (S, H) context staging buffer).
            attn = attn + jnp.dot(ctx.astype(bf16), wo_ref[0, c0:c1, :],
                                  preferred_element_type=f32)

        # TODO(synk): attn_dropout / proj_dropout / mlp dropout are identity
        # here (inference / eval-mode semantics).
        x = x + attn + bo_ref[0]

        # ------------------ MLP sub-block (pre-LN) ------------------
        xn2 = _layernorm(x, ln2g_ref[0], ln2b_ref[0]).astype(bf16)
        m = jnp.dot(xn2, w1_ref[0], preferred_element_type=f32) + b1_ref[0]
        m = _gelu_exact(m).astype(bf16)
        y = jnp.dot(m, w2_ref[0], preferred_element_type=f32) + b2_ref[0]
        out_ref[bi] = x + y                   # carry residual to next layer
        return carry

    lax.fori_loop(0, batch_tile, sample_body, 0)

    # Final encoder_norm after the last layer, applied to the whole tile.
    @pl.when(layer == n_layers - 1)
    def _():
        y = out_ref[...]
        out_ref[...] = _layernorm(y, encg_ref[...], encb_ref[...])


def init_params(key, *, num_layers, hidden, mlp_dim):
    """Deterministic synthetic parameters (shapes follow the torch module).

    Wq/Wk/Wv are fused into one (H, 3H) weight.  Matmul weights are bf16
    (f32 accumulation in-kernel); biases / LayerNorm affine params stay f32.
    """
    L, H, M = num_layers, hidden, mlp_dim
    ks = jax.random.split(key, 8)
    f32, bf16 = jnp.float32, jnp.bfloat16

    def w(k, shape, scale=0.02, dtype=bf16):
        return (scale * jax.random.normal(k, shape)).astype(dtype)

    return dict(
        wqkv=w(ks[0], (L, H, 3 * H)), bqkv=w(ks[1], (L, 1, 3 * H), 0.01, f32),
        wo=w(ks[2], (L, H, H)), bo=w(ks[3], (L, 1, H), 0.01, f32),
        ln1g=jnp.ones((L, 1, H), f32), ln1b=jnp.zeros((L, 1, H), f32),
        ln2g=jnp.ones((L, 1, H), f32), ln2b=jnp.zeros((L, 1, H), f32),
        w1=w(ks[4], (L, H, M)), b1=w(ks[5], (L, 1, M), 1e-6, f32),
        w2=w(ks[6], (L, M, H)), b2=w(ks[7], (L, 1, H), 1e-6, f32),
        encg=jnp.ones((1, H), f32),
        encb=jnp.zeros((1, H), f32),
    )


def encoder_forward(x, params, *, num_heads, batch_tile=8):
    """Matches Encoder.forward(hidden_states) with vis=False (eval mode)."""
    B, S, H = x.shape
    L = params['wqkv'].shape[0]
    M = params['w1'].shape[-1]
    x = x.astype(jnp.float32)

    # Pad S to a sublane multiple (e.g. 197 -> 200); padded key positions are
    # masked to -inf before softmax and padded rows are dropped on output.
    # Pad B so each grid step processes a full batch tile.
    s_pad = ((S + 7) // 8) * 8
    bt = max(1, min(B, batch_tile))
    b_pad = ((B + bt - 1) // bt) * bt
    if s_pad != S or b_pad != B:
        x = jnp.pad(x, ((0, b_pad - B), (0, s_pad - S), (0, 0)))
    key_mask = jnp.where(jnp.arange(s_pad) < S, 0.0, -1e30)
    key_mask = key_mask.astype(jnp.float32).reshape(1, s_pad)

    kernel = functools.partial(_encoder_kernel, num_heads=num_heads,
                               batch_tile=bt)

    def per_layer(tail):
        zeros = (0,) * len(tail)
        return pl.BlockSpec((1,) + tail, lambda b, l: (l,) + zeros)

    def per_chunk(tail):
        zeros = (0,) * len(tail)
        return pl.BlockSpec((bt,) + tail, lambda b, l: (b,) + zeros)

    def shared(shape):
        zeros = (0,) * len(shape)
        return pl.BlockSpec(shape, lambda b, l: zeros)

    in_specs = [
        per_chunk((s_pad, H)),                          # hidden_states tile
        shared((1, s_pad)),                             # additive key mask
        per_layer((H, 3 * H)), per_layer((1, 3 * H)),   # fused Wqkv, bqkv
        per_layer((H, H)), per_layer((1, H)),           # Wo, bo
        per_layer((1, H)), per_layer((1, H)),           # ln1 gamma, beta
        per_layer((1, H)), per_layer((1, H)),           # ln2 gamma, beta
        per_layer((H, M)), per_layer((1, M)),           # fc1 w, b
        per_layer((M, H)), per_layer((1, H)),           # fc2 w, b
        shared((1, H)), shared((1, H)),                 # encoder_norm gamma, beta
    ]

    # VMEM budget: double-buffered per-layer weight slab + activation tiles +
    # in-kernel intermediates, capped at ~13/16 of *physical* VMEM per
    # generation (v7x 64 MiB -> ~52 MiB; v5e/v6e 128 MiB -> ~104 MiB).
    weight_bytes = 2 * (4 * H * H + 2 * H * M)          # bf16 weights / layer
    small_bytes = 4 * (11 * H + M)                      # f32 biases + LN params
    act_bytes = 4 * bt * s_pad * H * 2                  # x tile + out tile (f32)
    inter_bytes = 4 * (3 * s_pad * H + s_pad * M + 2 * s_pad * s_pad
                       + 2 * s_pad * H)                 # qkv, mlp, scores, acc
    need = 2 * (weight_bytes + small_bytes) + 2 * act_bytes + inter_bytes + (8 << 20)
    try:
        phys = getattr(pltpu.get_tpu_info(), 'vmem_capacity_bytes', 64 << 20)
    except Exception:
        phys = 64 << 20
    vmem_limit = int(max(32 << 20, min(need, (phys * 13) // 16)))

    out = pl.pallas_call(
        kernel,
        out_shape=jax.ShapeDtypeStruct((b_pad, s_pad, H), jnp.float32),
        grid_spec=pltpu.PrefetchScalarGridSpec(
            num_scalar_prefetch=0,
            grid=(b_pad // bt, L),               # batch-chunks outer, layers inner
            in_specs=in_specs,
            out_specs=pl.BlockSpec((bt, s_pad, H), lambda b, l: (b, 0, 0)),
        ),
        compiler_params=pltpu.CompilerParams(
            dimension_semantics=("parallel", "arbitrary"),
            vmem_limit_bytes=vmem_limit),
    )(x, key_mask,
      params['wqkv'], params['bqkv'], params['wo'], params['bo'],
      params['ln1g'], params['ln1b'], params['ln2g'], params['ln2b'],
      params['w1'], params['b1'], params['w2'], params['b2'],
      params['encg'], params['encb'])

    out = out[:B, :S, :]
    attn_weights = []   # vis=False -> Attention returns weights=None, list stays empty
    return out, attn_weights


if __name__ == "__main__":
    # Small ViT-like config: hidden=32, heads=4, mlp_dim=64, 2 layers,
    # batch=2, sequence length 8.  (Too small to reflect real TPU perf — tune
    # batch_tile / buffering only at padded, realistic shapes.)
    B, S, H, NH, M, L = 2, 8, 32, 4, 64, 2

    key = jax.random.PRNGKey(0)
    kx, kp = jax.random.split(key)
    hidden_states = jax.random.normal(kx, (B, S, H), jnp.float32)
    params = init_params(kp, num_layers=L, hidden=H, mlp_dim=M)

    encoded, attn_w = encoder_forward(hidden_states, params, num_heads=NH)
    jax.block_until_ready(encoded)

    assert encoded.shape == (B, S, H)
    assert encoded.dtype == jnp.float32
    assert attn_w == []
    print("KERNEL_OK")
</pallas_src>

<mosaic_0001>
module attributes {stable_mosaic.version = 11 : i64} {
  func.func @_encoder_kernel(%arg0: i32, %arg1: i32, %arg2: memref<2x8x32xf32, #tpu.memory_space<vmem>>, %arg3: memref<1x8xf32, #tpu.memory_space<vmem>>, %arg4: memref<1x32x96xbf16, #tpu.memory_space<vmem>>, %arg5: memref<1x1x96xf32, #tpu.memory_space<vmem>>, %arg6: memref<1x32x32xbf16, #tpu.memory_space<vmem>>, %arg7: memref<1x1x32xf32, #tpu.memory_space<vmem>>, %arg8: memref<1x1x32xf32, #tpu.memory_space<vmem>>, %arg9: memref<1x1x32xf32, #tpu.memory_space<vmem>>, %arg10: memref<1x1x32xf32, #tpu.memory_space<vmem>>, %arg11: memref<1x1x32xf32, #tpu.memory_space<vmem>>, %arg12: memref<1x32x64xbf16, #tpu.memory_space<vmem>>, %arg13: memref<1x1x64xf32, #tpu.memory_space<vmem>>, %arg14: memref<1x64x32xbf16, #tpu.memory_space<vmem>>, %arg15: memref<1x1x32xf32, #tpu.memory_space<vmem>>, %arg16: memref<1x32xf32, #tpu.memory_space<vmem>>, %arg17: memref<1x32xf32, #tpu.memory_space<vmem>>, %arg18: memref<2x8x32xf32, #tpu.memory_space<vmem>>) attributes {dimension_semantics = [#tpu.dimension_semantics<parallel>, #tpu.dimension_semantics<arbitrary>], iteration_bounds = array<i64: 1, 2>, scalar_prefetch = 0 : i64, scratch_operands = 0 : i64, tpu.core_type = #tpu.core_type<tc>, window_params = [{transform_indices = @transform_0, window_bounds = array<i64: 2, 8, 32>}, {pipeline_mode = #tpu.pipeline_mode<synchronous>, transform_indices = @transform_1, window_bounds = array<i64: 1, 8>}, {transform_indices = @transform_2, window_bounds = array<i64: 1, 32, 96>}, {transform_indices = @transform_3, window_bounds = array<i64: 1, 1, 96>}, {transform_indices = @transform_4, window_bounds = array<i64: 1, 32, 32>}, {transform_indices = @transform_5, window_bounds = array<i64: 1, 1, 32>}, {transform_indices = @transform_6, window_bounds = array<i64: 1, 1, 32>}, {transform_indices = @transform_7, window_bounds = array<i64: 1, 1, 32>}, {transform_indices = @transform_8, window_bounds = array<i64: 1, 1, 32>}, {transform_indices = @transform_9, window_bounds = array<i64: 1, 1, 32>}, {transform_indices = @transform_10, window_bounds = array<i64: 1, 32, 64>}, {transform_indices = @transform_11, window_bounds = array<i64: 1, 1, 64>}, {transform_indices = @transform_12, window_bounds = array<i64: 1, 64, 32>}, {transform_indices = @transform_13, window_bounds = array<i64: 1, 1, 32>}, {pipeline_mode = #tpu.pipeline_mode<synchronous>, transform_indices = @transform_14, window_bounds = array<i64: 1, 32>}, {pipeline_mode = #tpu.pipeline_mode<synchronous>, transform_indices = @transform_15, window_bounds = array<i64: 1, 32>}, {transform_indices = @transform_16, window_bounds = array<i64: 2, 8, 32>}]} {
    %c0_i32 = arith.constant 0 : i32
    %0 = arith.cmpi eq, %arg1, %c0_i32 : i32
    %1 = arith.extui %0 : i1 to i32
    %c0_i32_0 = arith.constant 0 : i32
    %2 = arith.cmpi ne, %1, %c0_i32_0 : i32
    scf.if %2 {
      %c0_6 = arith.constant 0 : index
      %c0_7 = arith.constant 0 : index
      %c0_8 = arith.constant 0 : index
      %8 = vector.load %arg2[%c0_6, %c0_7, %c0_8] : memref<2x8x32xf32, #tpu.memory_space<vmem>>, vector<2x8x32xf32>
      %c0_9 = arith.constant 0 : index
      %c0_10 = arith.constant 0 : index
      %c0_11 = arith.constant 0 : index
      %9 = vector.load %arg18[%c0_9, %c0_10, %c0_11] : memref<2x8x32xf32, #tpu.memory_space<vmem>>, vector<2x8x32xf32>
      tpu.vector_store %arg18[%c0_9, %c0_10, %c0_11], %8 {strides = array<i32>} : memref<2x8x32xf32, #tpu.memory_space<vmem>>, vector<2x8x32xf32>,
    } else {
    }
    %c0 = arith.constant 0 : index
    %c0_1 = arith.constant 0 : index
    %3 = vector.load %arg3[%c0, %c0_1] : memref<1x8xf32, #tpu.memory_space<vmem>>, vector<1x8xf32>
    %c0_i32_2 = arith.constant 0 : i32
    %c2_i32 = arith.constant 2 : i32
    %4 = arith.addi %c0_i32_2, %c2_i32 : i32
    %c1_i32 = arith.constant 1 : i32
    scf.for %arg19 = %c0_i32_2 to %4 step %c1_i32  : i32 {
      %8 = arith.index_cast %arg19 : i32 to index
      %c0_6 = arith.constant 0 : index
      %c0_7 = arith.constant 0 : index
      %9 = vector.load %arg18[%8, %c0_6, %c0_7] : memref<2x8x32xf32, #tpu.memory_space<vmem>>, vector<1x8x32xf32>
      %10 = vector.shape_cast %9 : vector<1x8x32xf32> to vector<8x32xf32>
      %c0_8 = arith.constant 0 : index
      %c0_9 = arith.constant 0 : index
      %c0_10 = arith.constant 0 : index
      %11 = vector.load %arg8[%c0_8, %c0_9, %c0_10] : memref<1x1x32xf32, #tpu.memory_space<vmem>>, vector<1x1x32xf32>
      %12 = vector.shape_cast %11 : vector<1x1x32xf32> to vector<1x32xf32>
      %c0_11 = arith.constant 0 : index
      %c0_12 = arith.constant 0 : index
      %c0_13 = arith.constant 0 : index
      %13 = vector.load %arg9[%c0_11, %c0_12, %c0_13] : memref<1x1x32xf32, #tpu.memory_space<vmem>>, vector<1x1x32xf32>
      %14 = vector.shape_cast %13 : vector<1x1x32xf32> to vector<1x32xf32>
      %cst = arith.constant dense<0.000000e+00> : vector<8xf32>
      %15 = vector.multi_reduction <add>, %10, %cst [1] : vector<8x32xf32> to vector<8xf32>
      %16 = vector.shape_cast %15 : vector<8xf32> to vector<8x1xf32>
      %cst_14 = arith.constant 3.200000e+01 : f32
      %17 = vector.broadcast %cst_14 : f32 to vector<8x1xf32>
      %18 = arith.divf %16, %17 : vector<8x1xf32>
      %19 = arith.mulf %10, %10 : vector<8x32xf32>
      %cst_15 = arith.constant dense<0.000000e+00> : vector<8xf32>
      %20 = vector.multi_reduction <add>, %19, %cst_15 [1] : vector<8x32xf32> to vector<8xf32>
      %21 = vector.shape_cast %20 : vector<8xf32> to vector<8x1xf32>
      %cst_16 = arith.constant 3.200000e+01 : f32
      %22 = vector.broadcast %cst_16 : f32 to vector<8x1xf32>
      %23 = arith.divf %21, %22 : vector<8x1xf32>
      %24 = arith.mulf %18, %18 : vector<8x1xf32>
      %25 = arith.subf %23, %24 : vector<8x1xf32>
      %cst_17 = arith.constant 0.000000e+00 : f32
      %26 = vector.broadcast %cst_17 : f32 to vector<8x1xf32>
      %27 = arith.maximumf %25, %26 : vector<8x1xf32>
      %28 = vector.broadcast %18 : vector<8x1xf32> to vector<8x32xf32>
      %29 = arith.subf %10, %28 : vector<8x32xf32>
      %cst_18 = arith.constant 9.99999997E-7 : f32
      %30 = vector.broadcast %cst_18 : f32 to vector<8x1xf32>
      %31 = arith.addf %27, %30 : vector<8x1xf32>
      %32 = math.rsqrt %31 : vector<8x1xf32>
      %33 = vector.broadcast %32 : vector<8x1xf32> to vector<8x32xf32>
      %34 = arith.mulf %29, %33 : vector<8x32xf32>
      %35 = vector.broadcast %12 : vector<1x32xf32> to vector<8x32xf32>
      %36 = arith.mulf %34, %35 : vector<8x32xf32>
      %37 = vector.broadcast %14 : vector<1x32xf32> to vector<8x32xf32>
      %38 = arith.addf %36, %37 : vector<8x32xf32>
      %39 = arith.truncf %38 : vector<8x32xf32> to vector<8x32xbf16>
      %c0_19 = arith.constant 0 : index
      %c0_20 = arith.constant 0 : index
      %c0_21 = arith.constant 0 : index
      %40 = vector.load %arg4[%c0_19, %c0_20, %c0_21] : memref<1x32x96xbf16, #tpu.memory_space<vmem>>, vector<1x32x96xbf16>
      %41 = vector.shape_cast %40 : vector<1x32x96xbf16> to vector<32x96xbf16>
      %cst_22 = arith.constant dense<0.000000e+00> : vector<8x96xf32>
      %42 = tpu.matmul %39, %41, %cst_22 {dimension_numbers = #tpu.dot_dimension_numbers<[1], [0], [0], [1], [0, 0, 1, 1], [], []>} : vector<8x32xbf16>, vector<32x96xbf16>, vector<8x96xf32> -> vector<8x96xf32>
      %c0_23 = arith.constant 0 : index
      %c0_24 = arith.constant 0 : index
      %c0_25 = arith.constant 0 : index
      %43 = vector.load %arg5[%c0_23, %c0_24, %c0_25] : memref<1x1x96xf32, #tpu.memory_space<vmem>>, vector<1x1x96xf32>
      %44 = vector.shape_cast %43 : vector<1x1x96xf32> to vector<1x96xf32>
      %45 = vector.broadcast %44 : vector<1x96xf32> to vector<8x96xf32>
      %46 = arith.addf %42, %45 : vector<8x96xf32>
      %47 = vector.extract_strided_slice %46 {offsets = [0, 0], sizes = [8, 32], strides = [1, 1]} : vector<8x96xf32> to vector<8x32xf32>
      %cst_26 = arith.constant 0.353553385 : f32
      %48 = vector.broadcast %cst_26 : f32 to vector<8x32xf32>
      %49 = arith.mulf %47, %48 : vector<8x32xf32>
      %50 = arith.truncf %49 : vector<8x32xf32> to vector<8x32xbf16>
      %51 = vector.extract_strided_slice %46 {offsets = [0, 32], sizes = [8, 32], strides = [1, 1]} : vector<8x96xf32> to vector<8x32xf32>
      %52 = arith.truncf %51 : vector<8x32xf32> to vector<8x32xbf16>
      %53 = vector.extract_strided_slice %46 {offsets = [0, 64], sizes = [8, 32], strides = [1, 1]} : vector<8x96xf32> to vector<8x32xf32>
      %54 = arith.truncf %53 : vector<8x32xf32> to vector<8x32xbf16>
      %cst_27 = arith.constant 0.000000e+00 : f32
      %55 = vector.broadcast %cst_27 : f32 to vector<8x32xf32>
      %56 = vector.extract_strided_slice %50 {offsets = [0, 0], sizes = [8, 8], strides = [1, 1]} : vector<8x32xbf16> to vector<8x8xbf16>
      %57 = vector.extract_strided_slice %52 {offsets = [0, 0], sizes = [8, 8], strides = [1, 1]} : vector<8x32xbf16> to vector<8x8xbf16>
      %cst_28 = arith.constant dense<0.000000e+00> : vector<8x8xf32>
      %58 = tpu.matmul %56, %57, %cst_28 {dimension_numbers = #tpu.dot_dimension_numbers<[1], [1], [0], [0], [0, 0, 1, 0], [], []>} : vector<8x8xbf16>, vector<8x8xbf16>, vector<8x8xf32> -> vector<8x8xf32>
      %59 = vector.broadcast %3 : vector<1x8xf32> to vector<8x8xf32>
      %60 = arith.addf %58, %59 : vector<8x8xf32>
      %cst_29 = arith.constant dense<0xFF800000> : vector<8xf32>
      %61 = vector.multi_reduction <maximumf>, %60, %cst_29 [1] : vector<8x8xf32> to vector<8xf32>
      %62 = vector.shape_cast %61 : vector<8xf32> to vector<8x1xf32>
      %63 = vector.broadcast %62 : vector<8x1xf32> to vector<8x8xf32>
      %64 = arith.subf %60, %63 : vector<8x8xf32>
      %65 = math.exp %64 : vector<8x8xf32>
      %cst_30 = arith.constant dense<0.000000e+00> : vector<8xf32>
      %66 = vector.multi_reduction <add>, %65, %cst_30 [1] : vector<8x8xf32> to vector<8xf32>
      %67 = vector.shape_cast %66 : vector<8xf32> to vector<8x1xf32>
      %cst_31 = arith.constant 1.000000e+00 : f32
      %68 = vector.broadcast %cst_31 : f32 to vector<8x1xf32>
      %69 = arith.divf %68, %67 : vector<8x1xf32>
      %70 = vector.broadcast %69 : vector<8x1xf32> to vector<8x8xf32>
      %71 = arith.mulf %65, %70 : vector<8x8xf32>
      %72 = arith.truncf %71 : vector<8x8xf32> to vector<8x8xbf16>
      %73 = vector.extract_strided_slice %54 {offsets = [0, 0], sizes = [8, 8], strides = [1, 1]} : vector<8x32xbf16> to vector<8x8xbf16>
      %cst_32 = arith.constant dense<0.000000e+00> : vector<8x8xf32>
      %74 = tpu.matmul %72, %73, %cst_32 {dimension_numbers = #tpu.dot_dimension_numbers<[1], [0], [0], [1], [0, 0, 1, 1], [], []>} : vector<8x8xbf16>, vector<8x8xbf16>, vector<8x8xf32> -> vector<8x8xf32>
      %75 = arith.truncf %74 : vector<8x8xf32> to vector<8x8xbf16>
      %c0_33 = arith.constant 0 : index
      %c0_34 = arith.constant 0 : index
      %c0_35 = arith.constant 0 : index
      %76 = vector.load %arg6[%c0_33, %c0_34, %c0_35] : memref<1x32x32xbf16, #tpu.memory_space<vmem>>, vector<1x8x32xbf16>
      %77 = vector.shape_cast %76 : vector<1x8x32xbf16> to vector<8x32xbf16>
      %cst_36 = arith.constant dense<0.000000e+00> : vector<8x32xf32>
      %78 = tpu.matmul %75, %77, %cst_36 {dimension_numbers = #tpu.dot_dimension_numbers<[1], [0], [0], [1], [0, 0, 1, 1], [], []>} : vector<8x8xbf16>, vector<8x32xbf16>, vector<8x32xf32> -> vector<8x32xf32>
      %79 = arith.addf %55, %78 : vector<8x32xf32>
      %80 = vector.extract_strided_slice %50 {offsets = [0, 8], sizes = [8, 8], strides = [1, 1]} : vector<8x32xbf16> to vector<8x8xbf16>
      %81 = vector.extract_strided_slice %52 {offsets = [0, 8], sizes = [8, 8], strides = [1, 1]} : vector<8x32xbf16> to vector<8x8xbf16>
      %cst_37 = arith.constant dense<0.000000e+00> : vector<8x8xf32>
      %82 = tpu.matmul %80, %81, %cst_37 {dimension_numbers = #tpu.dot_dimension_numbers<[1], [1], [0], [0], [0, 0, 1, 0], [], []>} : vector<8x8xbf16>, vector<8x8xbf16>, vector<8x8xf32> -> vector<8x8xf32>
      %83 = vector.broadcast %3 : vector<1x8xf32> to vector<8x8xf32>
      %84 = arith.addf %82, %83 : vector<8x8xf32>
      %cst_38 = arith.constant dense<0xFF800000> : vector<8xf32>
      %85 = vector.multi_reduction <maximumf>, %84, %cst_38 [1] : vector<8x8xf32> to vector<8xf32>
      %86 = vector.shape_cast %85 : vector<8xf32> to vector<8x1xf32>
      %87 = vector.broadcast %86 : vector<8x1xf32> to vector<8x8xf32>
      %88 = arith.subf %84, %87 : vector<8x8xf32>
      %89 = math.exp %88 : vector<8x8xf32>
      %cst_39 = arith.constant dense<0.000000e+00> : vector<8xf32>
      %90 = vector.multi_reduction <add>, %89, %cst_39 [1] : vector<8x8xf32> to vector<8xf32>
      %91 = vector.shape_cast %90 : vector<8xf32> to vector<8x1xf32>
      %cst_40 = arith.constant 1.000000e+00 : f32
      %92 = vector.broadcast %cst_40 : f32 to vector<8x1xf32>
      %93 = arith.divf %92, %91 : vector<8x1xf32>
      %94 = vector.broadcast %93 : vector<8x1xf32> to vector<8x8xf32>
      %95 = arith.mulf %89, %94 : vector<8x8xf32>
      %96 = arith.truncf %95 : vector<8x8xf32> to vector<8x8xbf16>
      %97 = vector.extract_strided_slice %54 {offsets = [0, 8], sizes = [8, 8], strides = [1, 1]} : vector<8x32xbf16> to vector<8x8xbf16>
      %cst_41 = arith.constant dense<0.000000e+00> : vector<8x8xf32>
      %98 = tpu.matmul %96, %97, %cst_41 {dimension_numbers = #tpu.dot_dimension_numbers<[1], [0], [0], [1], [0, 0, 1, 1], [], []>} : vector<8x8xbf16>, vector<8x8xbf16>, vector<8x8xf32> -> vector<8x8xf32>
      %99 = arith.truncf %98 : vector<8x8xf32> to vector<8x8xbf16>
      %c0_42 = arith.constant 0 : index
      %c8 = arith.constant 8 : index
      %c0_43 = arith.constant 0 : index
      %100 = vector.load %arg6[%c0_42, %c8, %c0_43] : memref<1x32x32xbf16, #tpu.memory_space<vmem>>, vector<1x8x32xbf16>
      %101 = vector.shape_cast %100 : vector<1x8x32xbf16> to vector<8x32xbf16>
      %cst_44 = arith.constant dense<0.000000e+00> : vector<8x32xf32>
      %102 = tpu.matmul %99, %101, %cst_44 {dimension_numbers = #tpu.dot_dimension_numbers<[1], [0], [0], [1], [0, 0, 1, 1], [], []>} : vector<8x8xbf16>, vector<8x32xbf16>, vector<8x32xf32> -> vector<8x32xf32>
      %103 = arith.addf %79, %102 : vector<8x32xf32>
      %104 = vector.extract_strided_slice %50 {offsets = [0, 16], sizes = [8, 8], strides = [1, 1]} : vector<8x32xbf16> to vector<8x8xbf16>
      %105 = vector.extract_strided_slice %52 {offsets = [0, 16], sizes = [8, 8], strides = [1, 1]} : vector<8x32xbf16> to vector<8x8xbf16>
      %cst_45 = arith.constant dense<0.000000e+00> : vector<8x8xf32>
      %106 = tpu.matmul %104, %105, %cst_45 {dimension_numbers = #tpu.dot_dimension_numbers<[1], [1], [0], [0], [0, 0, 1, 0], [], []>} : vector<8x8xbf16>, vector<8x8xbf16>, vector<8x8xf32> -> vector<8x8xf32>
      %107 = vector.broadcast %3 : vector<1x8xf32> to vector<8x8xf32>
      %108 = arith.addf %106, %107 : vector<8x8xf32>
      %cst_46 = arith.constant dense<0xFF800000> : vector<8xf32>
      %109 = vector.multi_reduction <maximumf>, %108, %cst_46 [1] : vector<8x8xf32> to vector<8xf32>
      %110 = vector.shape_cast %109 : vector<8xf32> to vector<8x1xf32>
      %111 = vector.broadcast %110 : vector<8x1xf32> to vector<8x8xf32>
      %112 = arith.subf %108, %111 : vector<8x8xf32>
      %113 = math.exp %112 : vector<8x8xf32>
      %cst_47 = arith.constant dense<0.000000e+00> : vector<8xf32>
      %114 = vector.multi_reduction <add>, %113, %cst_47 [1] : vector<8x8xf32> to vector<8xf32>
      %115 = vector.shape_cast %114 : vector<8xf32> to vector<8x1xf32>
      %cst_48 = arith.constant 1.000000e+00 : f32
      %116 = vector.broadcast %cst_48 : f32 to vector<8x1xf32>
      %117 = arith.divf %116, %115 : vector<8x1xf32>
      %118 = vector.broadcast %117 : vector<8x1xf32> to vector<8x8xf32>
      %119 = arith.mulf %113, %118 : vector<8x8xf32>
      %120 = arith.truncf %119 : vector<8x8xf32> to vector<8x8xbf16>
      %121 = vector.extract_strided_slice %54 {offsets = [0, 16], sizes = [8, 8], strides = [1, 1]} : vector<8x32xbf16> to vector<8x8xbf16>
      %cst_49 = arith.constant dense<0.000000e+00> : vector<8x8xf32>
      %122 = tpu.matmul %120, %121, %cst_49 {dimension_numbers = #tpu.dot_dimension_numbers<[1], [0], [0], [1], [0, 0, 1, 1], [], []>} : vector<8x8xbf16>, vector<8x8xbf16>, vector<8x8xf32> -> vector<8x8xf32>
      %123 = arith.truncf %122 : vector<8x8xf32> to vector<8x8xbf16>
      %c0_50 = arith.constant 0 : index
      %c16 = arith.constant 16 : index
      %c0_51 = arith.constant 0 : index
      %124 = vector.load %arg6[%c0_50, %c16, %c0_51] : memref<1x32x32xbf16, #tpu.memory_space<vmem>>, vector<1x8x32xbf16>
      %125 = vector.shape_cast %124 : vector<1x8x32xbf16> to vector<8x32xbf16>
      %cst_52 = arith.constant dense<0.000000e+00> : vector<8x32xf32>
      %126 = tpu.matmul %123, %125, %cst_52 {dimension_numbers = #tpu.dot_dimension_numbers<[1], [0], [0], [1], [0, 0, 1, 1], [], []>} : vector<8x8xbf16>, vector<8x32xbf16>, vector<8x32xf32> -> vector<8x32xf32>
      %127 = arith.addf %103, %126 : vector<8x32xf32>
      %128 = vector.extract_strided_slice %50 {offsets = [0, 24], sizes = [8, 8], strides = [1, 1]} : vector<8x32xbf16> to vector<8x8xbf16>
      %129 = vector.extract_strided_slice %52 {offsets = [0, 24], sizes = [8, 8], strides = [1, 1]} : vector<8x32xbf16> to vector<8x8xbf16>
      %cst_53 = arith.constant dense<0.000000e+00> : vector<8x8xf32>
      %130 = tpu.matmul %128, %129, %cst_53 {dimension_numbers = #tpu.dot_dimension_numbers<[1], [1], [0], [0], [0, 0, 1, 0], [], []>} : vector<8x8xbf16>, vector<8x8xbf16>, vector<8x8xf32> -> vector<8x8xf32>
      %131 = vector.broadcast %3 : vector<1x8xf32> to vector<8x8xf32>
      %132 = arith.addf %130, %131 : vector<8x8xf32>
      %cst_54 = arith.constant dense<0xFF800000> : vector<8xf32>
      %133 = vector.multi_reduction <maximumf>, %132, %cst_54 [1] : vector<8x8xf32> to vector<8xf32>
      %134 = vector.shape_cast %133 : vector<8xf32> to vector<8x1xf32>
      %135 = vector.broadcast %134 : vector<8x1xf32> to vector<8x8xf32>
      %136 = arith.subf %132, %135 : vector<8x8xf32>
      %137 = math.exp %136 : vector<8x8xf32>
      %cst_55 = arith.constant dense<0.000000e+00> : vector<8xf32>
      %138 = vector.multi_reduction <add>, %137, %cst_55 [1] : vector<8x8xf32> to vector<8xf32>
      %139 = vector.shape_cast %138 : vector<8xf32> to vector<8x1xf32>
      %cst_56 = arith.constant 1.000000e+00 : f32
      %140 = vector.broadcast %cst_56 : f32 to vector<8x1xf32>
      %141 = arith.divf %140, %139 : vector<8x1xf32>
      %142 = vector.broadcast %141 : vector<8x1xf32> to vector<8x8xf32>
      %143 = arith.mulf %137, %142 : vector<8x8xf32>
      %144 = arith.truncf %143 : vector<8x8xf32> to vector<8x8xbf16>
      %145 = vector.extract_strided_slice %54 {offsets = [0, 24], sizes = [8, 8], strides = [1, 1]} : vector<8x32xbf16> to vector<8x8xbf16>
      %cst_57 = arith.constant dense<0.000000e+00> : vector<8x8xf32>
      %146 = tpu.matmul %144, %145, %cst_57 {dimension_numbers = #tpu.dot_dimension_numbers<[1], [0], [0], [1], [0, 0, 1, 1], [], []>} : vector<8x8xbf16>, vector<8x8xbf16>, vector<8x8xf32> -> vector<8x8xf32>
      %147 = arith.truncf %146 : vector<8x8xf32> to vector<8x8xbf16>
      %c0_58 = arith.constant 0 : index
      %c24 = arith.constant 24 : index
      %c0_59 = arith.constant 0 : index
      %148 = vector.load %arg6[%c0_58, %c24, %c0_59] : memref<1x32x32xbf16, #tpu.memory_space<vmem>>, vector<1x8x32xbf16>
      %149 = vector.shape_cast %148 : vector<1x8x32xbf16> to vector<8x32xbf16>
      %cst_60 = arith.constant dense<0.000000e+00> : vector<8x32xf32>
      %150 = tpu.matmul %147, %149, %cst_60 {dimension_numbers = #tpu.dot_dimension_numbers<[1], [0], [0], [1], [0, 0, 1, 1], [], []>} : vector<8x8xbf16>, vector<8x32xbf16>, vector<8x32xf32> -> vector<8x32xf32>
      %151 = arith.addf %127, %150 : vector<8x32xf32>
      %152 = arith.addf %10, %151 : vector<8x32xf32>
      %c0_61 = arith.constant 0 : index
      %c0_62 = arith.constant 0 : index
      %c0_63 = arith.constant 0 : index
      %153 = vector.load %arg7[%c0_61, %c0_62, %c0_63] : memref<1x1x32xf32, #tpu.memory_space<vmem>>, vector<1x1x32xf32>
      %154 = vector.shape_cast %153 : vector<1x1x32xf32> to vector<1x32xf32>
      %155 = vector.broadcast %154 : vector<1x32xf32> to vector<8x32xf32>
      %156 = arith.addf %152, %155 : vector<8x32xf32>
      %c0_64 = arith.constant 0 : index
      %c0_65 = arith.constant 0 : index
      %c0_66 = arith.constant 0 : index
      %157 = vector.load %arg10[%c0_64, %c0_65, %c0_66] : memref<1x1x32xf32, #tpu.memory_space<vmem>>, vector<1x1x32xf32>
      %158 = vector.shape_cast %157 : vector<1x1x32xf32> to vector<1x32xf32>
      %c0_67 = arith.constant 0 : index
      %c0_68 = arith.constant 0 : index
      %c0_69 = arith.constant 0 : index
      %159 = vector.load %arg11[%c0_67, %c0_68, %c0_69] : memref<1x1x32xf32, #tpu.memory_space<vmem>>, vector<1x1x32xf32>
      %160 = vector.shape_cast %159 : vector<1x1x32xf32> to vector<1x32xf32>
      %cst_70 = arith.constant dense<0.000000e+00> : vector<8xf32>
      %161 = vector.multi_reduction <add>, %156, %cst_70 [1] : vector<8x32xf32> to vector<8xf32>
      %162 = vector.shape_cast %161 : vector<8xf32> to vector<8x1xf32>
      %cst_71 = arith.constant 3.200000e+01 : f32
      %163 = vector.broadcast %cst_71 : f32 to vector<8x1xf32>
      %164 = arith.divf %162, %163 : vector<8x1xf32>
      %165 = arith.mulf %156, %156 : vector<8x32xf32>
      %cst_72 = arith.constant dense<0.000000e+00> : vector<8xf32>
      %166 = vector.multi_reduction <add>, %165, %cst_72 [1] : vector<8x32xf32> to vector<8xf32>
      %167 = vector.shape_cast %166 : vector<8xf32> to vector<8x1xf32>
      %cst_73 = arith.constant 3.200000e+01 : f32
      %168 = vector.broadcast %cst_73 : f32 to vector<8x1xf32>
      %169 = arith.divf %167, %168 : vector<8x1xf32>
      %170 = arith.mulf %164, %164 : vector<8x1xf32>
      %171 = arith.subf %169, %170 : vector<8x1xf32>
      %cst_74 = arith.constant 0.000000e+00 : f32
      %172 = vector.broadcast %cst_74 : f32 to vector<8x1xf32>
      %173 = arith.maximumf %171, %172 : vector<8x1xf32>
      %174 = vector.broadcast %164 : vector<8x1xf32> to vector<8x32xf32>
      %175 = arith.subf %156, %174 : vector<8x32xf32>
      %cst_75 = arith.constant 9.99999997E-7 : f32
      %176 = vector.broadcast %cst_75 : f32 to vector<8x1xf32>
      %177 = arith.addf %173, %176 : vector<8x1xf32>
      %178 = math.rsqrt %177 : vector<8x1xf32>
      %179 = vector.broadcast %178 : vector<8x1xf32> to vector<8x32xf32>
      %180 = arith.mulf %175, %179 : vector<8x32xf32>
      %181 = vector.broadcast %158 : vector<1x32xf32> to vector<8x32xf32>
      %182 = arith.mulf %180, %181 : vector<8x32xf32>
      %183 = vector.broadcast %160 : vector<1x32xf32> to vector<8x32xf32>
      %184 = arith.addf %182, %183 : vector<8x32xf32>
      %185 = arith.truncf %184 : vector<8x32xf32> to vector<8x32xbf16>
      %c0_76 = arith.constant 0 : index
      %c0_77 = arith.constant 0 : index
      %c0_78 = arith.constant 0 : index
      %186 = vector.load %arg12[%c0_76, %c0_77, %c0_78] : memref<1x32x64xbf16, #tpu.memory_space<vmem>>, vector<1x32x64xbf16>
      %187 = vector.shape_cast %186 : vector<1x32x64xbf16> to vector<32x64xbf16>
      %cst_79 = arith.constant dense<0.000000e+00> : vector<8x64xf32>
      %188 = tpu.matmul %185, %187, %cst_79 {dimension_numbers = #tpu.dot_dimension_numbers<[1], [0], [0], [1], [0, 0, 1, 1], [], []>} : vector<8x32xbf16>, vector<32x64xbf16>, vector<8x64xf32> -> vector<8x64xf32>
      %c0_80 = arith.constant 0 : index
      %c0_81 = arith.constant 0 : index
      %c0_82 = arith.constant 0 : index
      %189 = vector.load %arg13[%c0_80, %c0_81, %c0_82] : memref<1x1x64xf32, #tpu.memory_space<vmem>>, vector<1x1x64xf32>
      %190 = vector.shape_cast %189 : vector<1x1x64xf32> to vector<1x64xf32>
      %191 = vector.broadcast %190 : vector<1x64xf32> to vector<8x64xf32>
      %192 = arith.addf %188, %191 : vector<8x64xf32>
      %cst_83 = arith.constant 5.000000e-01 : f32
      %193 = vector.broadcast %cst_83 : f32 to vector<8x64xf32>
      %194 = arith.mulf %193, %192 : vector<8x64xf32>
      %cst_84 = arith.constant 0.707106769 : f32
      %195 = vector.broadcast %cst_84 : f32 to vector<8x64xf32>
      %196 = arith.mulf %192, %195 : vector<8x64xf32>
      %cst_85 = arith.constant -4.000000e+00 : f32
      %cst_86 = arith.constant 4.000000e+00 : f32
      %197 = vector.broadcast %cst_85 : f32 to vector<8x64xf32>
      %198 = arith.maximumf %197, %196 : vector<8x64xf32>
      %199 = vector.broadcast %cst_86 : f32 to vector<8x64xf32>
      %200 = arith.minimumf %199, %198 : vector<8x64xf32>
      %201 = arith.mulf %200, %200 : vector<8x64xf32>
      %cst_87 = arith.constant -2.72614237E-10 : f32
      %202 = vector.broadcast %cst_87 : f32 to vector<8x64xf32>
      %203 = arith.mulf %202, %201 : vector<8x64xf32>
      %cst_88 = arith.constant 2.77068146E-8 : f32
      %204 = vector.broadcast %cst_88 : f32 to vector<8x64xf32>
      %205 = arith.addf %203, %204 : vector<8x64xf32>
      %206 = arith.mulf %205, %201 : vector<8x64xf32>
      %cst_89 = arith.constant -2.10102394E-6 : f32
      %207 = vector.broadcast %cst_89 : f32 to vector<8x64xf32>
      %208 = arith.addf %206, %207 : vector<8x64xf32>
      %209 = arith.mulf %208, %201 : vector<8x64xf32>
      %cst_90 = arith.constant -5.69250624E-5 : f32
      %210 = vector.broadcast %cst_90 : f32 to vector<8x64xf32>
      %211 = arith.addf %209, %210 : vector<8x64xf32>
      %212 = arith.mulf %211, %201 : vector<8x64xf32>
      %cst_91 = arith.constant -7.34990637E-4 : f32
      %213 = vector.broadcast %cst_91 : f32 to vector<8x64xf32>
      %214 = arith.addf %212, %213 : vector<8x64xf32>
      %215 = arith.mulf %214, %201 : vector<8x64xf32>
      %cst_92 = arith.constant -0.00295460015 : f32
      %216 = vector.broadcast %cst_92 : f32 to vector<8x64xf32>
      %217 = arith.addf %215, %216 : vector<8x64xf32>
      %218 = arith.mulf %217, %201 : vector<8x64xf32>
      %cst_93 = arith.constant -0.0160960332 : f32
      %219 = vector.broadcast %cst_93 : f32 to vector<8x64xf32>
      %220 = arith.addf %218, %219 : vector<8x64xf32>
      %cst_94 = arith.constant -1.45660715E-5 : f32
      %221 = vector.broadcast %cst_94 : f32 to vector<8x64xf32>
      %222 = arith.mulf %221, %201 : vector<8x64xf32>
      %cst_95 = arith.constant -2.13374049E-4 : f32
      %223 = vector.broadcast %cst_95 : f32 to vector<8x64xf32>
      %224 = arith.addf %222, %223 : vector<8x64xf32>
      %225 = arith.mulf %224, %201 : vector<8x64xf32>
      %cst_96 = arith.constant -0.00168282702 : f32
      %226 = vector.broadcast %cst_96 : f32 to vector<8x64xf32>
      %227 = arith.addf %225, %226 : vector<8x64xf32>
      %228 = arith.mulf %227, %201 : vector<8x64xf32>
      %cst_97 = arith.constant -0.00737332925 : f32
      %229 = vector.broadcast %cst_97 : f32 to vector<8x64xf32>
      %230 = arith.addf %228, %229 : vector<8x64xf32>
      %231 = arith.mulf %230, %201 : vector<8x64xf32>
      %cst_98 = arith.constant -0.0142647391 : f32
      %232 = vector.broadcast %cst_98 : f32 to vector<8x64xf32>
      %233 = arith.addf %231, %232 : vector<8x64xf32>
      %234 = arith.mulf %200, %220 : vector<8x64xf32>
      %235 = arith.divf %234, %233 : vector<8x64xf32>
      %cst_99 = arith.constant 1.000000e+00 : f32
      %236 = vector.broadcast %cst_99 : f32 to vector<8x64xf32>
      %237 = arith.addf %236, %235 : vector<8x64xf32>
      %238 = arith.mulf %194, %237 : vector<8x64xf32>
      %239 = arith.truncf %238 : vector<8x64xf32> to vector<8x64xbf16>
      %c0_100 = arith.constant 0 : index
      %c0_101 = arith.constant 0 : index
      %c0_102 = arith.constant 0 : index
      %240 = vector.load %arg14[%c0_100, %c0_101, %c0_102] : memref<1x64x32xbf16, #tpu.memory_space<vmem>>, vector<1x64x32xbf16>
      %241 = vector.shape_cast %240 : vector<1x64x32xbf16> to vector<64x32xbf16>
      %cst_103 = arith.constant dense<0.000000e+00> : vector<8x32xf32>
      %242 = tpu.matmul %239, %241, %cst_103 {dimension_numbers = #tpu.dot_dimension_numbers<[1], [0], [0], [1], [0, 0, 1, 1], [], []>} : vector<8x64xbf16>, vector<64x32xbf16>, vector<8x32xf32> -> vector<8x32xf32>
      %c0_104 = arith.constant 0 : index
      %c0_105 = arith.constant 0 : index
      %c0_106 = arith.constant 0 : index
      %243 = vector.load %arg15[%c0_104, %c0_105, %c0_106] : memref<1x1x32xf32, #tpu.memory_space<vmem>>, vector<1x1x32xf32>
      %244 = vector.shape_cast %243 : vector<1x1x32xf32> to vector<1x32xf32>
      %245 = vector.broadcast %244 : vector<1x32xf32> to vector<8x32xf32>
      %246 = arith.addf %242, %245 : vector<8x32xf32>
      %247 = arith.addf %156, %246 : vector<8x32xf32>
      %248 = arith.index_cast %arg19 : i32 to index
      %c0_107 = arith.constant 0 : index
      %c0_108 = arith.constant 0 : index
      %249 = vector.load %arg18[%248, %c0_107, %c0_108] : memref<2x8x32xf32, #tpu.memory_space<vmem>>, vector<1x8x32xf32>
      %250 = vector.shape_cast %249 : vector<1x8x32xf32> to vector<8x32xf32>
      %251 = vector.shape_cast %247 : vector<8x32xf32> to vector<1x8x32xf32>
      tpu.vector_store %arg18[%248, %c0_107, %c0_108], %251 {strides = array<i32>} : memref<2x8x32xf32, #tpu.memory_space<vmem>>, vector<1x8x32xf32>,
    }
    %c2_i32_3 = arith.constant 2 : i32
    %c1_i32_4 = arith.constant 1 : i32
    %5 = arith.cmpi eq, %arg1, %c1_i32_4 : i32
    %6 = arith.extui %5 : i1 to i32
    %c0_i32_5 = arith.constant 0 : i32
    %7 = arith.cmpi ne, %6, %c0_i32_5 : i32
    scf.if %7 {
      %c0_6 = arith.constant 0 : index
      %c0_7 = arith.constant 0 : index
      %c0_8 = arith.constant 0 : index
      %8 = vector.load %arg18[%c0_6, %c0_7, %c0_8] : memref<2x8x32xf32, #tpu.memory_space<vmem>>, vector<2x8x32xf32>
      %c0_9 = arith.constant 0 : index
      %c0_10 = arith.constant 0 : index
      %9 = vector.load %arg16[%c0_9, %c0_10] : memref<1x32xf32, #tpu.memory_space<vmem>>, vector<1x32xf32>
      %c0_11 = arith.constant 0 : index
      %c0_12 = arith.constant 0 : index
      %10 = vector.load %arg17[%c0_11, %c0_12] : memref<1x32xf32, #tpu.memory_space<vmem>>, vector<1x32xf32>
      %cst = arith.constant dense<0.000000e+00> : vector<2x8xf32>
      %11 = vector.multi_reduction <add>, %8, %cst [2] : vector<2x8x32xf32> to vector<2x8xf32>
      %12 = vector.shape_cast %11 : vector<2x8xf32> to vector<2x8x1xf32>
      %cst_13 = arith.constant 3.200000e+01 : f32
      %13 = vector.broadcast %cst_13 : f32 to vector<2x8x1xf32>
      %14 = arith.divf %12, %13 : vector<2x8x1xf32>
      %15 = arith.mulf %8, %8 : vector<2x8x32xf32>
      %cst_14 = arith.constant dense<0.000000e+00> : vector<2x8xf32>
      %16 = vector.multi_reduction <add>, %15, %cst_14 [2] : vector<2x8x32xf32> to vector<2x8xf32>
      %17 = vector.shape_cast %16 : vector<2x8xf32> to vector<2x8x1xf32>
      %cst_15 = arith.constant 3.200000e+01 : f32
      %18 = vector.broadcast %cst_15 : f32 to vector<2x8x1xf32>
      %19 = arith.divf %17, %18 : vector<2x8x1xf32>
      %20 = arith.mulf %14, %14 : vector<2x8x1xf32>
      %21 = arith.subf %19, %20 : vector<2x8x1xf32>
      %cst_16 = arith.constant 0.000000e+00 : f32
      %22 = vector.broadcast %cst_16 : f32 to vector<2x8x1xf32>
      %23 = arith.maximumf %21, %22 : vector<2x8x1xf32>
      %24 = vector.broadcast %14 : vector<2x8x1xf32> to vector<2x8x32xf32>
      %25 = arith.subf %8, %24 : vector<2x8x32xf32>
      %cst_17 = arith.constant 9.99999997E-7 : f32
      %26 = vector.broadcast %cst_17 : f32 to vector<2x8x1xf32>
      %27 = arith.addf %23, %26 : vector<2x8x1xf32>
      %28 = math.rsqrt %27 : vector<2x8x1xf32>
      %29 = vector.broadcast %28 : vector<2x8x1xf32> to vector<2x8x32xf32>
      %30 = arith.mulf %25, %29 : vector<2x8x32xf32>
      %31 = vector.shape_cast %9 : vector<1x32xf32> to vector<1x1x32xf32>
      %32 = vector.broadcast %31 : vector<1x1x32xf32> to vector<2x8x32xf32>
      %33 = arith.mulf %30, %32 : vector<2x8x32xf32>
      %34 = vector.shape_cast %10 : vector<1x32xf32> to vector<1x1x32xf32>
      %35 = vector.broadcast %34 : vector<1x1x32xf32> to vector<2x8x32xf32>
      %36 = arith.addf %33, %35 : vector<2x8x32xf32>
      %c0_18 = arith.constant 0 : index
      %c0_19 = arith.constant 0 : index
      %c0_20 = arith.constant 0 : index
      %37 = vector.load %arg18[%c0_18, %c0_19, %c0_20] : memref<2x8x32xf32, #tpu.memory_space<vmem>>, vector<2x8x32xf32>
      tpu.vector_store %arg18[%c0_18, %c0_19, %c0_20], %36 {strides = array<i32>} : memref<2x8x32xf32, #tpu.memory_space<vmem>>, vector<2x8x32xf32>,
    } else {
    }
    return
  }
  func.func @transform_0(%arg0: i32, %arg1: i32) -> (i32, i32, i32) {
    %c0_i32 = arith.constant 0 : i32
    %c0_i32_0 = arith.constant 0 : i32
    %c0_i32_1 = arith.constant 0 : i32
    return %arg0, %c0_i32, %c0_i32_0 : i32, i32, i32
  }
  func.func @transform_1(%arg0: i32, %arg1: i32) -> (i32, i32) {
    %c0_i32 = arith.constant 0 : i32
    %c0_i32_0 = arith.constant 0 : i32
    %c0_i32_1 = arith.constant 0 : i32
    return %c0_i32, %c0_i32_0 : i32, i32
  }
  func.func @transform_2(%arg0: i32, %arg1: i32) -> (i32, i32, i32) {
    %c0_i32 = arith.constant 0 : i32
    %c0_i32_0 = arith.constant 0 : i32
    %c0_i32_1 = arith.constant 0 : i32
    return %arg1, %c0_i32, %c0_i32_0 : i32, i32, i32
  }
  func.func @transform_3(%arg0: i32, %arg1: i32) -> (i32, i32, i32) {
    %c0_i32 = arith.constant 0 : i32
    %c0_i32_0 = arith.constant 0 : i32
    %c0_i32_1 = arith.constant 0 : i32
    return %arg1, %c0_i32, %c0_i32_0 : i32, i32, i32
  }
  func.func @transform_4(%arg0: i32, %arg1: i32) -> (i32, i32, i32) {
    %c0_i32 = arith.constant 0 : i32
    %c0_i32_0 = arith.constant 0 : i32
    %c0_i32_1 = arith.constant 0 : i32
    return %arg1, %c0_i32, %c0_i32_0 : i32, i32, i32
  }
  func.func @transform_5(%arg0: i32, %arg1: i32) -> (i32, i32, i32) {
    %c0_i32 = arith.constant 0 : i32
    %c0_i32_0 = arith.constant 0 : i32
    %c0_i32_1 = arith.constant 0 : i32
    return %arg1, %c0_i32, %c0_i32_0 : i32, i32, i32
  }
  func.func @transform_6(%arg0: i32, %arg1: i32) -> (i32, i32, i32) {
    %c0_i32 = arith.constant 0 : i32
    %c0_i32_0 = arith.constant 0 : i32
    %c0_i32_1 = arith.constant 0 : i32
    return %arg1, %c0_i32, %c0_i32_0 : i32, i32, i32
  }
  func.func @transform_7(%arg0: i32, %arg1: i32) -> (i32, i32, i32) {
    %c0_i32 = arith.constant 0 : i32
    %c0_i32_0 = arith.constant 0 : i32
    %c0_i32_1 = arith.constant 0 : i32
    return %arg1, %c0_i32, %c0_i32_0 : i32, i32, i32
  }
  func.func @transform_8(%arg0: i32, %arg1: i32) -> (i32, i32, i32) {
    %c0_i32 = arith.constant 0 : i32
    %c0_i32_0 = arith.constant 0 : i32
    %c0_i32_1 = arith.constant 0 : i32
    return %arg1, %c0_i32, %c0_i32_0 : i32, i32, i32
  }
  func.func @transform_9(%arg0: i32, %arg1: i32) -> (i32, i32, i32) {
    %c0_i32 = arith.constant 0 : i32
    %c0_i32_0 = arith.constant 0 : i32
    %c0_i32_1 = arith.constant 0 : i32
    return %arg1, %c0_i32, %c0_i32_0 : i32, i32, i32
  }
  func.func @transform_10(%arg0: i32, %arg1: i32) -> (i32, i32, i32) {
    %c0_i32 = arith.constant 0 : i32
    %c0_i32_0 = arith.constant 0 : i32
    %c0_i32_1 = arith.constant 0 : i32
    return %arg1, %c0_i32, %c0_i32_0 : i32, i32, i32
  }
  func.func @transform_11(%arg0: i32, %arg1: i32) -> (i32, i32, i32) {
    %c0_i32 = arith.constant 0 : i32
    %c0_i32_0 = arith.constant 0 : i32
    %c0_i32_1 = arith.constant 0 : i32
    return %arg1, %c0_i32, %c0_i32_0 : i32, i32, i32
  }
  func.func @transform_12(%arg0: i32, %arg1: i32) -> (i32, i32, i32) {
    %c0_i32 = arith.constant 0 : i32
    %c0_i32_0 = arith.constant 0 : i32
    %c0_i32_1 = arith.constant 0 : i32
    return %arg1, %c0_i32, %c0_i32_0 : i32, i32, i32
  }
  func.func @transform_13(%arg0: i32, %arg1: i32) -> (i32, i32, i32) {
    %c0_i32 = arith.constant 0 : i32
    %c0_i32_0 = arith.constant 0 : i32
    %c0_i32_1 = arith.constant 0 : i32
    return %arg1, %c0_i32, %c0_i32_0 : i32, i32, i32
  }
  func.func @transform_14(%arg0: i32, %arg1: i32) -> (i32, i32) {
    %c0_i32 = arith.constant 0 : i32
    %c0_i32_0 = arith.constant 0 : i32
    %c0_i32_1 = arith.constant 0 : i32
    return %c0_i32, %c0_i32_0 : i32, i32
  }
  func.func @transform_15(%arg0: i32, %arg1: i32) -> (i32, i32) {
    %c0_i32 = arith.constant 0 : i32
    %c0_i32_0 = arith.constant 0 : i32
    %c0_i32_1 = arith.constant 0 : i32
    return %c0_i32, %c0_i32_0 : i32, i32
  }
  func.func @transform_16(%arg0: i32, %arg1: i32) -> (i32, i32, i32) {
    %c0_i32 = arith.constant 0 : i32
    %c0_i32_0 = arith.constant 0 : i32
    %c0_i32_1 = arith.constant 0 : i32
    return %arg0, %c0_i32, %c0_i32_0 : i32, i32, i32
  }
}

</mosaic_0001>

<bundles_post_ra>
// kernel: tpu_custom_call.1
= control target key start
LH: loop header
LB: loop body
LE: loop exit
PB: predicated region body
PF: predicated region fallthrough
CT: control target
= control target key end

     0   :  { %s3025_s0 = inlined_call_operand.hbm [shape: f32[2,8,32], index: 0, kind: input, shape index: {}]   ;;  %s3026_s1 = inlined_call_operand.vmem [shape: f32[1,8], index: 1, kind: input, shape index: {}]   ;;  %s3027_s2 = inlined_call_operand.vmem [shape: bf16[2,32,96], index: 2, kind: input, shape index: {}]   ;;  %s3028_s3 = inlined_call_operand.vmem [shape: f32[2,1,96], index: 3, kind: input, shape index: {}]   ;;  %s3029_s4 = inlined_call_operand.vmem [shape: bf16[2,32,32], index: 4, kind: input, shape index: {}]   ;;  %s3030_s5 = inlined_call_operand.vmem [shape: f32[2,1,32], index: 5, kind: input, shape index: {}]   ;;  %s3031_s6 = inlined_call_operand.vmem [shape: f32[2,1,32], index: 6, kind: input, shape index: {}]   ;;  %s3032_s7 = inlined_call_operand.vmem [shape: f32[2,1,32], index: 7, kind: input, shape index: {}]   ;;  %s3033_s8 = inlined_call_operand.vmem [shape: f32[2,1,32], index: 8, kind: input, shape index: {}]   ;;  %s3034_s9 = inlined_call_operand.vmem [shape: f32[2,1,32], index: 9, kind: input, shape index: {}]   ;;  %s3035_s10 = inlined_call_operand.vmem [shape: bf16[2,32,64], index: 10, kind: input, shape index: {}]   ;;  %s3036_s11 = inlined_call_operand.hbm [shape: f32[2,1,64], index: 11, kind: input, shape index: {}]   ;;  %s3037_s12 = inlined_call_operand.vmem [shape: bf16[2,64,32], index: 12, kind: input, shape index: {}]   ;;  %s3038_s13 = inlined_call_operand.vmem [shape: f32[2,1,32], index: 13, kind: input, shape index: {}]   ;;  %s3039_s14 = inlined_call_operand.vmem [shape: f32[1,32], index: 14, kind: input, shape index: {}]   ;;  %s3040_s15 = inlined_call_operand.vmem [shape: f32[1,32], index: 15, kind: input, shape index: {}]   ;;  %s3041_s16 = inlined_call_operand.hbm [shape: f32[2,8,32], index: 16, kind: output, shape index: {}]  }
   0x1   :  { %3055 = sst [smem:[#allocation17_spill]] %s3025_s0 }
   0x2   :  { %3056 = sst [smem:[#allocation18_spill]] %s3026_s1 }
   0x3   :  { %3057 = sst [smem:[#allocation19_spill]] %s3027_s2 }
   0x4   :  { %3058 = sst [smem:[#allocation20_spill]] %s3029_s4 }
   0x5   :  { %3059 = sst [smem:[#allocation21_spill]] %s3035_s10 }
   0x6   :  { %3060 = sst [smem:[#allocation22_spill]] %s3036_s11 }
   0x7   :  { %3061 = sst [smem:[#allocation23_spill]] %s3037_s12 }
   0x8   :  { %3062 = sst [smem:[#allocation24_spill]] %s3038_s13 }
   0x9   :  { %3063 = sst [smem:[#allocation25_spill]] %s3039_s14 }
   0xa   :  { %3064 = sst [smem:[#allocation26_spill]] %s3040_s15 }
   0xb   :  { %3065 = sst [smem:[#allocation27_spill]] %s3041_s16 }
   0xc   :  { %21 = vsyncpa [#allocation3], 0 }
   0xd   :  { %22 = vsyncpa [#allocation6], 0 }
   0xe   :  { %24 = vsyncpa [#allocation6 + $0x1], 0 }
   0xf   :  { %25 = vsyncpa [#allocation4], 0  ;;  %s2583_s21 = smov 0   ;;  %s2585_s22 = smov 0  }
  0x10   :  { %s2587_s23 = smov 0   ;;  %s2589_s24 = smov 0  }
  0x11   :  { %s2591_s25 = smov 0   ;;  %s2593_s26 = smov 0  }
  0x12 LB: > { %3066 = sst [smem:[#allocation11_spill]] %s2456_s22  ;;  %s3043_s27 = sadd.s32 4294967295, %s2472_s26   ;;  %s2472_s26 = sphi %s2593_s26, %s31_s26   ;;  %s2468_s25 = sphi %s2591_s25, %s3104_s25   ;;  %s2464_s24 = sphi %s2589_s24, %s3103_s24   ;;  %s2460_s23 = sphi %s2587_s23, %s3102_s23   ;;  %s2456_s22 = sphi %s2585_s22, %s3101_s22   ;;  %s2452_s21 = sphi %s2583_s21, %s3100_s21  }
  0x13   : > { %3067 = sst [smem:[#allocation12_spill]] %s2460_s23  ;;  %p344_p0 = scmp.ne.s32.totalorder %s2456_s22, %s2452_s21 }
  0x14   : > { %3068 = sst [smem:[#allocation13_spill]] %s2468_s25  ;;  %p2615_p1 = scmp.eq.s32.totalorder %s3043_s27, 0 }
  0x15   : > { %3069 = sst [smem:[#allocation14_spill]] %s2472_s26  ;;  %p1999_p2 = scmp.ge.s32.totalorder %s2472_s26, 1 }
  0x16   : > { %s3070_s28 = scalar_select %p2615_p1, 1, 0 }
  0x17   : > { %p475_p3 = scmp.lt.s32.totalorder %s2472_s26, 3  ;;  %p2623_p4 = por %p2615_p1, %p344_p0 }
  0x18   : > { %s2478_s0 = smov [#allocation2]   ;;  %s40_s19 = sadd.s32 1, %s2468_s25 }
  0x19   : > { %s3071_s29 = scalar_select %p2623_p4, 1, 0 }
  0x1a   : > { %p2627_p5 = pnand %p1999_p2, %p475_p3  ;;  %s490_s17 = sshll.u32 %s2478_s0, 4  ;;  %s491_s17 = int_to_ptr.vmem [resolvable:$true] %s490_s17 }
  0x1b   : > { %s3074_s27 = sld [smem:[#allocation17_spill]] }
  0x1c   : > { %s3072_s30 = scalar_select %p2627_p5, 1, 0 }
  0x1d   : > { %p2204_p6 = pneg %p2627_p5 }
  0x1f   : > { %p2635_p7 = pnand %p2204_p6, %p2615_p1 }
  0x21   : > { %s2326_s16 = scalar_lea.hbm %s3074_s27, 256  ;;  %p2328_p9 = pneg %p2635_p7 }
  0x22   : > { %p2327_p8 = scmp.ne.s32.totalorder %s3074_s27, %s2326_s16  ;;  %p2333_p12 = scmp.lt.u32.totalorder %s2326_s16, %s3074_s27 }
  0x24   : > { %p2329_p10 = pnand %p2328_p9, %p2327_p8 }
  0x26   : > { %p2330_p11 = pneg %p2329_p10 }
  0x28   : > { %p2335_p13 = pnand %p2333_p12, %p2330_p11 }
  0x2a   : > { %2338 = shalt.err (!%p2335_p13)
}
  0x2b   : > { %s2339_s12 = scalar_lea.vmem %s491_s17, 256  ;;  %p2347_p6 = scmp.lt.s32.totalorder %s491_s17, %s491_s17 }
  0x2c   : > { %p2340_p0 = scmp.ne.s32.totalorder %s491_s17, %s2339_s12  ;;  %p2348_p4 = scmp.lt.s32.totalorder %s2339_s12, %s2339_s12 }
  0x2e   : > { %p2342_p2 = pnand %p2340_p0, %p2328_p9  ;;  %p2349_p1 = por %p2348_p4, %p2347_p6 }
  0x30   : > { %p2343_p3 = pneg %p2342_p2 }
  0x32   : > { %p2350_p5 = pnand %p2349_p1, %p2343_p3 }
  0x34   : > { %2353 = shalt.err (!%p2350_p5)
}
  0x35   : > { %s2479_s14 = smov 128   ;;  %s2480_s1 = smov 8  }
  0x36   : > { %2207 = dma.hbm_to_vmem [thread:$0]  (!%p2635_p7), %s3074_s27, 256, %s491_s17, [#allocation3], %s2479_s14, %s2479_s14, %s2480_s1  }
  0x37   : > { %p41_p4 = scmp.ge.s32.totalorder %s40_s19, 2  ;;  %s331_s12 = sadd.s32 1, %s2460_s23 }
  0x38   : > { %p338_p1 = scmp.ne.s32.totalorder %s2460_s23, %s2456_s22  ;;  %p339_p5 = scmp.eq.s32.totalorder %s2472_s26, 0 }
  0x39   : > { %s3106_s19 = smov (%p41_p4, %s40_s19), 0  ;;  %p2213_p9 = scmp.lt.s32.totalorder %s2472_s26, 2 }
  0x3a   : > { %3075 = sst [smem:[#allocation15_spill]] %s3106_s19  ;;  %p340_p8 = por %p339_p5, %p338_p1 }
  0x3b   : > { %s328_s20 = ssub.s32 %s2468_s25, %s3106_s19  ;;  %s573_s21 = sand.u32 1, %s2460_s23  }
  0x3c   : > { %p329_p10 = scmp.eq.s32.totalorder %s328_s20, 0  ;;  %s2002_s0 = sshll.u32 %s2468_s25, 4 }
  0x3d   : > { %s3077_s11 = sld [smem:[#allocation22_spill]]  ;;  %s576_s17 = scalar_lea.vmem [#allocation5], %s573_s21 }
  0x3e   : > { %s2668_s13 = scalar_select %p329_p10, %s2460_s23, %s331_s12  }
  0x3f   : > { %s583_s14 = sshll.u32 %s576_s17, 4  ;;  %p2677_p7 = pnand %p2213_p9, %p340_p8  ;;  %s2675_s14 = int_to_ptr.vmem [resolvable:$true] %s583_s14 }
  0x40   : > { %3076 = sst [smem:[#allocation16_spill]] %s2668_s13  ;;  %s574_s16 = scalar_lea.sflag [#allocation6], %s573_s21 }
  0x41   : > { %p2356_p12 = pneg %p2677_p7 }
  0x43   : > { %s2673_s15 = scalar_lea.hbm %s3077_s11, %s2002_s0  ;;  %s2359_s0 = scalar_lea.hbm %s3077_s11, 32 }
  0x44   : > { %s2354_s12 = scalar_lea.hbm %s2673_s15, 16  ;;  %p2360_p2 = scmp.lt.u32.totalorder %s2673_s15, %s3077_s11 }
  0x45   : > { %p2355_p11 = scmp.ne.s32.totalorder %s2673_s15, %s2354_s12  ;;  %p2361_p3 = scmp.lt.u32.totalorder %s2359_s0, %s2354_s12 }
  0x46   : > { %p2363_p4 = scmp.lt.u32.totalorder %s2354_s12, %s2673_s15 }
  0x47   : > { %p2357_p13 = pnand %p2356_p12, %p2355_p11  ;;  %p2362_p6 = por %p2361_p3, %p2360_p2 }
  0x49   : > { %p2358_p0 = pneg %p2357_p13  ;;  %p2364_p1 = por %p2363_p4, %p2362_p6 }
  0x4b   : > { %p2365_p5 = pnand %p2364_p1, %p2358_p0 }
  0x4d   : > { %2368 = shalt.err (!%p2365_p5)
}
  0x4e   : > { %s2369_s21 = scalar_lea.vmem %s2675_s14, 16  ;;  %s2481_s10 = smov [#allocation5]  }
  0x4f   : > { %p2370_p8 = scmp.ne.s32.totalorder %s2675_s14, %s2369_s21  ;;  %s2374_s20 = sshll.u32 %s2481_s10, 4  ;;  %s2375_s20 = int_to_ptr.vmem [resolvable:$false] %s2374_s20 }
  0x50   : > { %s2376_s18 = scalar_lea.vmem %s2375_s20, 32  ;;  %p2377_p11 = scmp.lt.s32.totalorder %s2675_s14, %s2375_s20 }
  0x51   : > { %p2372_p9 = pnand %p2370_p8, %p2356_p12  ;;  %p2378_p13 = scmp.lt.s32.totalorder %s2376_s18, %s2369_s21 }
  0x53   : > { %p2373_p10 = pneg %p2372_p9  ;;  %p2379_p2 = por %p2378_p13, %p2377_p11 }
  0x55   : > { %p2380_p3 = pnand %p2379_p2, %p2373_p10 }
  0x57   : > { %2383 = shalt.err (!%p2380_p3)
}
  0x58   : > { %2211 = dma.hbm_to_vmem [thread:$0]  (!%p2677_p7), %s2673_s15, 16, %s2675_s14, %s574_s16  }
  0x59   : > { %p3079_p0 = scmp.ne.s32.totalorder %s3072_s30, 0 }
  0x5a   : > { %p3080_p12 = scmp.ne.s32.totalorder (!%p3079_p0), %s3070_s28, 0 }
  0x5b   : > { %606 = sbr.rel (%p3079_p0) target bundleno = 3765 (0xeb5), region = 84 }
  0x62   : > { %2439 = dma.done.wait (%p3080_p12), [#allocation3], 256  }
  0x63   : > { %2441 = vsyncadd (%p3080_p12), [#allocation3], 4294967040  ;;  %s612_s12 = sand.u32 1, %s2456_s22   ;;  %p3081_p6 = scmp.ne.s32.totalorder %s3071_s29, 0 }
  0x64   : > { %s613_s0 = scalar_lea.sflag [#allocation6], %s612_s12  ;;  %s2713_s17 = scalar_lea.vmem [#allocation5], %s612_s12 }
  0x65   : > { %2443 = dma.done.wait (%p3081_p6), %s613_s0, 16  }
  0x66   : > { %2445 = vsyncadd (%p3081_p6), %s613_s0, 4294967280  ;;  %p700_p7 = scmp.lt.s32.totalorder %s2464_s24, 1  ;;  %s3082_s2 = sld [smem:[#allocation19_spill]] }
  0x67   : > { %s3083_s4 = sld [smem:[#allocation20_spill]]  ;;  %s3084_s12 = sld [smem:[#allocation21_spill]] }
  0x68   : > { %s2721_s30 = scalar_select %p700_p7, %s2464_s24, 1 }
  0x69   : > { %s3085_s25 = sld [smem:[#allocation24_spill]]  ;;  %s3086_s29 = sld [smem:[#allocation23_spill]] }
  0x6a   : > { %s2055_s28 = sshll.u32 %s2721_s30, 4  ;;  %s727_s20 = scalar_lea.vmem %s3034_s9, %s2721_s30 }
  0x6b   : > { %s2058_s11 = sshll.u32 %s2721_s30, 5  ;;  %p2013_p4 = scmp.ne.s32.totalorder %s2464_s24, 0 }
  0x6c   : > { %s2731_s21 = scalar_lea.vmem %s3082_s2, %s2055_s28  ;;  %s724_s2 = scalar_lea.vmem %s3033_s8, %s2721_s30  ;;  %v747_v0 = vld [vmem:[#allocation2] sm:$0xff] (!%p2013_p4)  ;;  %vm749_vm0 = vcmask (!%p2013_p4), 261120   ;;  %v748_v1 = vld [vmem:[#allocation2 + $0x8] sm:$0xff] (!%p2013_p4) }
  0x6d   : > { %s2736_s18 = scalar_lea.vmem %s3083_s4, %s2055_s28  ;;  %s2761_s0 = scalar_lea.vmem %s3084_s12, %s2055_s28  ;;  %750 = vst.msk [vmem:[#allocation7] sm:$0xff] (!%p2013_p4), %vm749_vm0, %v747_v0  ;;  %751 = vst.msk [vmem:[#allocation7 + $0x8] sm:$0xff] (!%p2013_p4), %vm749_vm0, %v748_v1 }
  0x6e   : > { %746 = sbr.rel (%p2013_p4) target bundleno = 117 (0x75), region = 96 }
  0x6f   : > { %s740_s22 = scalar_lea.vmem %s3085_s25, %s2721_s30  ;;  %s2771_s26 = scalar_lea.vmem %s3086_s29, %s2058_s11 }
  0x75 PF: > { %s3087_s23 = sld [smem:[#allocation18_spill]]  ;;  %s2779_s25 = smov 0  }
  0x7b   : > { %v2777_v2 = vld [vmem:[%s3087_s23] ss:$0 sm:$0xff] }
  0x7c LB: >> { %s2014_s11 = sshll.u32 %s2476_s25, 3  ;;  %vm764_vm1 = vcmask 261120   ;;  %v2292_v7 = vld [vmem:[%s2731_s21] sm:$0xff]   ;;  %v2482_v8 = vmov 0.0   ;;  %vm2483_vm2 = vmmov 0   ;;  %v2293_v9 = vld [vmem:[%s2731_s21 + $0x8] sm:$0xff]   ;;  %s3088_s16 = scalar_lea.vmem %s3031_s6, %s2721_s30  ;;  %s2476_s25 = sphi %s2779_s25, %s758_s25  }
  0x7d   : >> { %s2785_s28 = scalar_lea.vmem [#allocation7], %s2014_s11  ;;  %2094 = vmatprep.subr.bf16.mxu1 %v2482_v8  ;;  %2098 = vmatprep.mubr.msk.bf16.mxu1 %vm2483_vm2, %v2482_v8  ;;  %v2015_v20 = vld [vmem:[%s3088_s16] ss:$0 sm:$0xff]  ;;  %s3089_s27 = scalar_lea.vmem %s3032_s7, %s2721_s30  ;;  %vm875_vm3 = vcmask 64512   ;;  %vm940_vm4 = vcmask 1043456   ;;  %vm1690_vm5 = vcmask 523264  }
  0x7e   : >> { %v2788_v3 = vld [vmem:[%s2785_s28] sm:$0xff]  ;;  %2095 = vmatpush3.bf16.msra.mxu1 %v2292_v7  ;;  %2108 = vmatprep.subr.bf16.mxu0 %v2482_v8  ;;  %s3090_s14 = scalar_lea.vmem %s3028_s3, %s2721_s30  ;;  %s2484_s4 = smov 96  }
  0x7f   : >> { %v765_v4 = vsel %vm764_vm1, %v2788_v3, 0.0  ;;  %v770_v5 = vmul.f32 %v2788_v3, %v2788_v3  ;;  %2096 = vmatprep.subr.bf16.mxu1 %v2482_v8  ;;  %2110 = vmatprep.mubr.msk.bf16.mxu0 %vm2483_vm2, %v2482_v8  ;;  %v2016_v22 = vld [vmem:[%s3089_s27] ss:$0 sm:$0xff]  ;;  %s2485_s13 = smov 120   ;;  %s2486_s23 = smov 88  }
  0x80   : >> { %766 = vadd.xlane.f32.xlu0 %v765_v4  ;;  %v2017_v26 = vld [vmem:[%s3090_s14] ss:$0 sm:$0xff]  ;;  %s2487_s11 = smov 56   ;;  %s2488_s29 = smov 64  }
  0x81   : >> { %v771_v6 = vsel %vm764_vm1, %v770_v5, 0.0  ;;  %s2489_s1 = smov 80   ;;  %s2490_s16 = smov 112  }
  0x82   : >> { %2097 = vmatpush3.bf16.msra.mxu1 %v2293_v9  ;;  %s2491_s10 = smov 48   ;;  %s2492_s12 = smov 104  }
  0x83   : >> { %2102 = vmatprep.subr.bf16.mxu1 %v2482_v8  ;;  %s2493_s27 = smov 72   ;;  %s2494_s19 = smov 40  }
  0x84   : >> { %772 = vadd.xlane.f32.xlu0 %v771_v6  ;;  %s758_s25 = sadd.s32 1, %s2476_s25  }
  0x85   : >> { %p755_p1 = scmp.ge.s32.totalorder %s758_s25, 2  }
  0x86   : > { %p2048_p5 = scmp.ne.s32.totalorder (%p755_p1), %s2464_s24, 1 }
 0x10d   : >> { %v767_v10 = vpop.xlane.xlu0 %766 }
 0x10e   : >> { %v769_v11 = vmul.f32 0.03125, %v767_v10 }
 0x110   : >> { %v775_v13 = vmul.f32 %v769_v11, %v769_v11  ;;  %v778_v18 = vsub.f32 %v2788_v3, %v769_v11 }
 0x111   : >> { %v773_v12 = vpop.xlane.xlu0 %772 }
 0x112   : >> { %v774_v14 = vmul.f32 0.03125, %v773_v12 }
 0x114   : >> { %v776_v15 = vsub.f32 %v774_v14, %v775_v13  ;;  %v985_v13 = vld [vmem:[%s2736_s18] sm:$0xf] }
 0x115   : >> { %v1150_v14 = vsel %vm940_vm4, %v985_v13, 0 }
 0x116   : >> { %v777_v16 = vmax.f32 %v776_v15, 0.0  ;;  %v1099_v15 = vld [vmem:[%s2736_s18 + $0x4] sm:$0xf] }
 0x118   : >> { %v779_v17 = vadd.f32 1e-06, %v777_v16  ;;  %v1104_v16 = vsel %vm940_vm4, %v1099_v15, 0 }
 0x11a   : >> { %2300 = vrsqrt.f32 %v779_v17 }
 0x124   : >> { %v2301_v19 = vpop.eup %2300 }
 0x125   : >> { %v781_v21 = vmul.f32 %v2301_v19, %v778_v18 }
 0x127   : >> { %v788_v23 = vmul.f32 %v2015_v20, %v781_v21 }
 0x129   : >> { %v795_v24 = vadd.f32 %v2016_v22, %v788_v23 }
 0x12b   : >> { %v796_v25 = vpack.c.bf16 %v795_v24, %v795_v24 }
 0x12d   : >> { %2099 = vmatmul.mubr.msk.bf16.vlgmr.msra.gmra.mrb[0].mxu1 %vm764_vm1, %v796_v25 }
 0x12e   : >> { %2104 = vmatprep.mubr.msk.bf16.mxu1 %vm2483_vm2, %v2482_v8 }
 0x200   : >> { %v857_v27 = vpop.f32.mrb[0].mxu1 }
 0x201   : >> { %v858_v28 = vadd.f32 %v2017_v26, %v857_v27  ;;  %v2100_v29 = vpop.f32.mrb[1].mxu1 }
 0x202   : >> { %v860_v30 = vpop.f32.mrb[2].mxu1 }
 0x203   : >> { %v863_v31 = vmul.f32 0.35355338, %v858_v28  ;;  %v2824_v32 = vpack.c.bf16 %v858_v28, %v858_v28  ;;  %v2101_v33 = vpop.f32.mrb[3].mxu1 }
 0x205   : >> { %v2826_v34 = vpack.c.bf16 %v863_v31, %v863_v31  ;;  %873 = vrot.lane.b32.xlu1 %v2824_v32, %s2484_s4  ;;  %s3091_s4 = scalar_lea.vmem %s3030_s5, %s2721_s30 }
 0x207   : >> { %987 = vrot.lane.b32.xlu0 %v2826_v34, %s2485_s13 }
 0x209   : >> { %989 = vrot.lane.b32.xlu1 %v2824_v32, %s2486_s23 }
 0x277   : >> { %v874_v35 = vpop.permute.xlu1 %873 }
 0x278   : >> { %v880_v36 = vsel %vm875_vm3, %v874_v35, 0 }
 0x279   : >> { %2103 = vmatpush3.bf16.xpose.msra.mxu1 %v880_v36  ;;  %v988_v39 = vpop.permute.xlu0 %987 }
 0x27a   : >> { %2114 = vmatprep.subr.bf16.mxu1 %v2482_v8 }
 0x27b   : >> { %v990_v37 = vpop.permute.xlu1 %989 }
 0x27c   : >> { %v995_v38 = vsel %vm875_vm3, %v990_v37, 0 }
 0x280   : >> { %2105 = vmatmul.mubr.msk.bf16.vlgmr.msra.gmra.mrb[4].mxu1 %vm875_vm3, %v2826_v34 }
 0x281   : >> { %2115 = vmatpush3.bf16.xpose.msra.mxu1 %v995_v38  ;;  %2116 = vmatprep.mubr.msk.bf16.mxu1 %vm2483_vm2, %v2482_v8 }
 0x282   : >> { %2126 = vmatprep.subr.bf16.mxu1 %v2482_v8 }
 0x288   : >> { %2117 = vmatmul.mubr.msk.bf16.vlgmr.msra.gmra.mrb[8].mxu1 %vm875_vm3, %v988_v39 }
 0x289   : >> { %2128 = vmatprep.mubr.msk.bf16.mxu1 %vm2483_vm2, %v2482_v8  ;;  %2127 = vmatpush3.bf16.msra.mxu1 %v1104_v16 }
 0x28a   : >> { %2138 = vmatprep.subr.bf16.mxu1 %v2482_v8 }
 0x353   : >> { %v916_v40 = vpop.f32.mrb[4].mxu1 }
 0x354   : >> { %v917_v41 = vadd.f32 %v2777_v2, %v916_v40  ;;  %v2106_v42 = vpop.f32.mrb[5].mxu1 }
 0x355   : >> { %v919_v43 = vpop.f32.mrb[6].mxu1 }
 0x356   : >> { %v2107_v44 = vpop.f32.mrb[7].mxu1  ;;  %v922_v45 = vsel %vm875_vm3, %v917_v41, -inf }
 0x357   : >> { %923 = vmax.xlane.f32.xlu1 %v922_v45 }
 0x35b   : >> { %v1031_v46 = vpop.f32.mrb[8].mxu1 }
 0x35c   : >> { %v1032_v47 = vadd.f32 %v2777_v2, %v1031_v46  ;;  %v2118_v48 = vpop.f32.mrb[9].mxu1 }
 0x35d   : >> { %v1034_v49 = vpop.f32.mrb[10].mxu1 }
 0x35e   : >> { %v2119_v50 = vpop.f32.mrb[11].mxu1  ;;  %v1037_v51 = vsel %vm875_vm3, %v1032_v47, -inf }
 0x35f   : >> { %1038 = vmax.xlane.f32.xlu0 %v1037_v51 }
 0x375   : >> { %1050 = vrot.lane.b32.xlu0 %v2824_v32, %s2487_s11 }
 0x3e4   : >> { %v924_v52 = vpop.xlane.xlu1 %923 }
 0x3e5   : >> { %v925_v53 = vsub.f32 %v917_v41, %v924_v52 }
 0x3e7   : >> { %v926_v54 = vmul.f32 1.442695, %v925_v53 }
 0x3e9   : >> { %2302 = vpow2.f32 %v926_v54 }
 0x3ec   : >> { %v1039_v55 = vpop.xlane.xlu0 %1038 }
 0x3ed   : >> { %v1040_v56 = vsub.f32 %v1032_v47, %v1039_v55 }
 0x3ef   : >> { %v1041_v57 = vmul.f32 1.442695, %v1040_v56 }
 0x3f0   : >> { %v1051_v6 = vpop.permute.xlu0 %1050 }
 0x3f1   : >> { %2304 = vpow2.f32 %v1041_v57  ;;  %v1056_v9 = vsel %vm940_vm4, %v1051_v6, 0 }
 0x3f3   : >> { %v2303_v58 = vpop.eup %2302 }
 0x3f4   : >> { %v928_v59 = vsel %vm875_vm3, %v2303_v58, 0.0 }
 0x3f5   : >> { %929 = vadd.xlane.f32.xlu1 %v928_v59 }
 0x3fb   : >> { %v2305_v60 = vpop.eup %2304 }
 0x3fc   : >> { %v1043_v61 = vsel %vm875_vm3, %v2305_v60, 0.0 }
 0x3fd   : >> { %1044 = vadd.xlane.f32.xlu1 %v1043_v61 }
 0x40e   : >> { %935 = vrot.lane.b32.xlu1 %v2824_v32, %s2488_s29 }
 0x412   : >> { %1194 = vrot.lane.b32.xlu1 %v2824_v32, %s2489_s1 }
 0x416   : >> { %1192 = vrot.lane.b32.xlu1 %v2826_v34, %s2490_s16 }
 0x482   : >> { %v930_v62 = vpop.xlane.xlu1 %929 }
 0x483   : >> { %2306 = vrcp.f32 %v930_v62 }
 0x48a   : >> { %v1045_v63 = vpop.xlane.xlu1 %1044 }
 0x48b   : >> { %2308 = vrcp.f32 %v1045_v63 }
 0x48d   : >> { %v2307_v0 = vpop.eup %2306 }
 0x48e   : >> { %v936_v1 = vpop.permute.xlu1 %935  ;;  %v933_v4 = vmul.f32 %v2307_v0, %v2303_v58 }
 0x48f   : >> { %v942_v5 = vsel %vm940_vm4, %v936_v1, 0 }
 0x490   : >> { %2109 = vmatpush3.bf16.msra.mxu0 %v942_v5  ;;  %v934_v7 = vpack.c.bf16 %v933_v4, %v933_v4 }
 0x491   : >> { %2120 = vmatprep.subr.bf16.mxu0 %v2482_v8 }
 0x492   : >> { %v1195_v22 = vpop.permute.xlu1 %1194 }
 0x493   : >> { %2111 = vmatmul.mubr.msk.bf16.vlgmr.msra.gmra.mrb[0].mxu0 %vm875_vm3, %v934_v7  ;;  %v1200_v27 = vsel %vm875_vm3, %v1195_v22, 0 }
 0x494   : >> { %2121 = vmatpush3.bf16.msra.mxu0 %v1056_v9  ;;  %2122 = vmatprep.mubr.msk.bf16.mxu0 %vm2483_vm2, %v2482_v8 }
 0x495   : >> { %v2309_v10 = vpop.eup %2308  ;;  %2132 = vmatprep.subr.bf16.mxu0 %v2482_v8 }
 0x496   : >> { %v1048_v11 = vmul.f32 %v2309_v10, %v2305_v60  ;;  %v1193_v29 = vpop.permute.xlu1 %1192  ;;  %v1304_v60 = vld [vmem:[%s2736_s18 + $0x8] sm:$0xf] }
 0x497   : >> { %v1309_v61 = vsel %vm940_vm4, %v1304_v60, 0 }
 0x498   : >> { %v1049_v12 = vpack.c.bf16 %v1048_v11, %v1048_v11 }
 0x49b   : >> { %2123 = vmatmul.mubr.msk.bf16.vlgmr.msra.gmra.mrb[4].mxu0 %vm875_vm3, %v1049_v12 }
 0x49c   : >> { %2134 = vmatprep.mubr.msk.bf16.mxu0 %vm2483_vm2, %v2482_v8  ;;  %2133 = vmatpush3.bf16.msra.mxu0 %v1150_v14 }
 0x49d   : >> { %2144 = vmatprep.subr.bf16.mxu0 %v2482_v8 }
 0x566   : >> { %v978_v17 = vpop.f32.mrb[0].mxu0 }
 0x567   : >> { %v984_v18 = vpack.c.bf16 %v978_v17, %v978_v17  ;;  %v2112_v19 = vpop.f32.mrb[1].mxu0  ;;  %v1464_v17 = vld [vmem:[%s2736_s18 + $0xc] sm:$0xf] }
 0x568   : >> { %v981_v20 = vpop.f32.mrb[2].mxu0 }
 0x569   : >> { %v2113_v21 = vpop.f32.mrb[3].mxu0  ;;  %2135 = vmatmul.mubr.msk.bf16.vlgmr.msra.gmra.mrb[8].mxu0 %vm875_vm3, %v984_v18  ;;  %v1469_v18 = vsel %vm940_vm4, %v1464_v17, 0 }
 0x56a   : >> { %2146 = vmatprep.mubr.msk.bf16.mxu0 %vm2483_vm2, %v2482_v8 }
 0x56e   : >> { %v1092_v23 = vpop.f32.mrb[4].mxu0 }
 0x56f   : >> { %v1098_v24 = vpack.c.bf16 %v1092_v23, %v1092_v23  ;;  %v2124_v25 = vpop.f32.mrb[5].mxu0 }
 0x570   : >> { %v1095_v26 = vpop.f32.mrb[6].mxu0 }
 0x571   : >> { %v2125_v28 = vpop.f32.mrb[7].mxu0  ;;  %2129 = vmatmul.mubr.msk.bf16.vlgmr.msra.gmra.mrb[12].mxu1 %vm875_vm3, %v1098_v24 }
 0x572   : >> { %2139 = vmatpush3.bf16.xpose.msra.mxu1 %v1200_v27  ;;  %2140 = vmatprep.mubr.msk.bf16.mxu1 %vm2483_vm2, %v2482_v8 }
 0x573   : >> { %2150 = vmatprep.subr.bf16.mxu1 %v2482_v8 }
 0x579   : >> { %2141 = vmatmul.mubr.msk.bf16.vlgmr.msra.gmra.mrb[16].mxu1 %vm875_vm3, %v1193_v29 }
 0x57a   : >> { %2152 = vmatprep.mubr.msk.bf16.mxu1 %vm2483_vm2, %v2482_v8  ;;  %2151 = vmatpush3.bf16.msra.mxu1 %v1309_v61 }
 0x57b   : >> { %2162 = vmatprep.subr.bf16.mxu1 %v2482_v8 }
 0x63c   : >> { %v1186_v30 = vpop.f32.mrb[8].mxu0 }
 0x63d   : >> { %v2136_v31 = vpop.f32.mrb[9].mxu0 }
 0x63e   : >> { %v1189_v33 = vpop.f32.mrb[10].mxu0 }
 0x63f   : >> { %v2137_v35 = vpop.f32.mrb[11].mxu0 }
 0x644   : >> { %v1140_v36 = vpop.f32.mrb[12].mxu1 }
 0x645   : >> { %v2879_v37 = vadd.f32 %v1186_v30, %v1140_v36  ;;  %v2130_v38 = vpop.f32.mrb[13].mxu1 }
 0x646   : >> { %v1143_v39 = vpop.f32.mrb[14].mxu1 }
 0x647   : >> { %v2131_v40 = vpop.f32.mrb[15].mxu1  ;;  %v2034_v39 = vld [vmem:[%s3091_s4] ss:$0 sm:$0xff] }
 0x64c   : >> { %v1236_v41 = vpop.f32.mrb[16].mxu1 }
 0x64d   : >> { %v1237_v42 = vadd.f32 %v2777_v2, %v1236_v41  ;;  %v2142_v43 = vpop.f32.mrb[17].mxu1 }
 0x64e   : >> { %v1239_v44 = vpop.f32.mrb[18].mxu1 }
 0x64f   : >> { %v2143_v45 = vpop.f32.mrb[19].mxu1  ;;  %v1242_v46 = vsel %vm875_vm3, %v1237_v42, -inf }
 0x650   : >> { %1243 = vmax.xlane.f32.xlu1 %v1242_v46 }
 0x661   : >> { %1255 = vrot.lane.b32.xlu1 %v2824_v32, %s2491_s10 }
 0x665   : >> { %1352 = vrot.lane.b32.xlu1 %v2826_v34, %s2492_s12 }
 0x6dd   : >> { %v1244_v47 = vpop.xlane.xlu1 %1243 }
 0x6de   : >> { %v1245_v48 = vsub.f32 %v1237_v42, %v1244_v47  ;;  %v2294_v47 = vld [vmem:[%s2761_s0] sm:$0xff]  }
 0x6e0   : >> { %v1246_v49 = vmul.f32 1.442695, %v1245_v48  ;;  %v2295_v48 = vld [vmem:[%s2761_s0 + $0x8] sm:$0xff]  }
 0x6e1   : >> { %v1256_v50 = vpop.permute.xlu1 %1255 }
 0x6e2   : >> { %2310 = vpow2.f32 %v1246_v49  ;;  %v1261_v51 = vsel %vm940_vm4, %v1256_v50, 0 }
 0x6e3   : >> { %2145 = vmatpush3.bf16.msra.mxu0 %v1261_v51 }
 0x6e4   : >> { %2156 = vmatprep.subr.bf16.mxu0 %v2482_v8 }
 0x6e5   : >> { %v1353_v59 = vpop.permute.xlu1 %1352 }
 0x6ec   : >> { %v2311_v52 = vpop.eup %2310 }
 0x6ed   : >> { %v1248_v53 = vsel %vm875_vm3, %v2311_v52, 0.0 }
 0x6ee   : >> { %1249 = vadd.xlane.f32.xlu0 %v1248_v53 }
 0x704   : >> { %1354 = vrot.lane.b32.xlu0 %v2824_v32, %s2493_s27 }
 0x77b   : >> { %v1250_v54 = vpop.xlane.xlu0 %1249 }
 0x77c   : >> { %2312 = vrcp.f32 %v1250_v54 }
 0x77f   : >> { %v1355_v56 = vpop.permute.xlu0 %1354 }
 0x780   : >> { %v1360_v58 = vsel %vm875_vm3, %v1355_v56, 0 }
 0x786   : >> { %v2313_v34 = vpop.eup %2312 }
 0x787   : >> { %v1253_v55 = vmul.f32 %v2313_v34, %v2311_v52 }
 0x789   : >> { %v1254_v57 = vpack.c.bf16 %v1253_v55, %v1253_v55 }
 0x78b   : >> { %2147 = vmatmul.mubr.msk.bf16.vlgmr.msra.gmra.mrb[12].mxu0 %vm875_vm3, %v1254_v57  ;;  %v2035_v57 = vld [vmem:[%s724_s2] ss:$0 sm:$0xff] }
 0x78c   : >> { %2157 = vmatpush3.bf16.xpose.msra.mxu0 %v1360_v58  ;;  %2158 = vmatprep.mubr.msk.bf16.mxu0 %vm2483_vm2, %v2482_v8 }
 0x78d   : >> { %2168 = vmatprep.subr.bf16.mxu0 %v2482_v8 }
 0x793   : >> { %2159 = vmatmul.mubr.msk.bf16.vlgmr.msra.gmra.mrb[16].mxu0 %vm875_vm3, %v1353_v59  ;;  %v2036_v59 = vld [vmem:[%s727_s20] ss:$0 sm:$0xff] }
 0x794   : >> { %2170 = vmatprep.mubr.msk.bf16.mxu0 %vm2483_vm2, %v2482_v8  ;;  %2169 = vmatpush3.bf16.msra.mxu0 %v1469_v18 }
 0x795   : >> { %2182 = vmatprep.subr.bf16.mxu0 %v2482_v8 }
 0x85e   : >> { %v1297_v62 = vpop.f32.mrb[12].mxu0 }
 0x85f   : >> { %v1303_v63 = vpack.c.bf16 %v1297_v62, %v1297_v62  ;;  %v2148_v0 = vpop.f32.mrb[13].mxu0 }
 0x860   : >> { %v1300_v1 = vpop.f32.mrb[14].mxu0  ;;  %v2297_v0 = vld [vmem:[%s2771_s26 + $0x8] sm:$0xff]  }
 0x861   : >> { %v2149_v4 = vpop.f32.mrb[15].mxu0  ;;  %2153 = vmatmul.mubr.msk.bf16.vlgmr.msra.gmra.mrb[20].mxu1 %vm875_vm3, %v1303_v63  ;;  %v2296_v63 = vld [vmem:[%s2771_s26] sm:$0xff]   ;;  %v2298_v1 = vld [vmem:[%s2771_s26 + $0x10] sm:$0xff]  }
 0x862   : >> { %2164 = vmatprep.mubr.msk.bf16.mxu1 %vm2483_vm2, %v2482_v8  ;;  %v2299_v4 = vld [vmem:[%s2771_s26 + $0x18] sm:$0xff]  }
 0x866   : >> { %v1396_v5 = vpop.f32.mrb[16].mxu0 }
 0x867   : >> { %v1397_v6 = vadd.f32 %v2777_v2, %v1396_v5  ;;  %v2160_v7 = vpop.f32.mrb[17].mxu0  ;;  %v2037_v5 = vld [vmem:[%s2713_s17] ss:$0 sm:$0xff] }
 0x868   : >> { %v1399_v9 = vpop.f32.mrb[18].mxu0 }
 0x869   : >> { %v2161_v10 = vpop.f32.mrb[19].mxu0  ;;  %v1402_v11 = vsel %vm875_vm3, %v1397_v6, -inf }
 0x86a   : >> { %1403 = vmax.xlane.f32.xlu1 %v1402_v11 }
 0x8f7   : >> { %v1404_v12 = vpop.xlane.xlu1 %1403 }
 0x8f8   : >> { %v1405_v13 = vsub.f32 %v1397_v6, %v1404_v12 }
 0x8fa   : >> { %v1406_v14 = vmul.f32 1.442695, %v1405_v13 }
 0x8fc   : >> { %2314 = vpow2.f32 %v1406_v14 }
 0x906   : >> { %v2315_v15 = vpop.eup %2314 }
 0x907   : >> { %v1408_v16 = vsel %vm875_vm3, %v2315_v15, 0.0 }
 0x908   : >> { %1409 = vadd.xlane.f32.xlu0 %v1408_v16 }
 0x91e   : >> { %1415 = vrot.lane.b32.xlu0 %v2824_v32, %s2494_s19 }
 0x934   : >> { %v1345_v19 = vpop.f32.mrb[20].mxu1 }
 0x935   : >> { %v1351_v20 = vadd.f32 %v1345_v19, %v2879_v37  ;;  %v2154_v21 = vpop.f32.mrb[21].mxu1 }
 0x936   : >> { %v1348_v22 = vpop.f32.mrb[22].mxu1 }
 0x937   : >> { %v2155_v23 = vpop.f32.mrb[23].mxu1 }
 0x995   : >> { %v1410_v24 = vpop.xlane.xlu0 %1409 }
 0x996   : >> { %2316 = vrcp.f32 %v1410_v24 }
 0x999   : >> { %v1416_v25 = vpop.permute.xlu0 %1415 }
 0x99a   : >> { %v1421_v26 = vsel %vm940_vm4, %v1416_v25, 0 }
 0x99b   : >> { %2163 = vmatpush3.bf16.msra.mxu1 %v1421_v26 }
 0x99c   : >> { %2174 = vmatprep.subr.bf16.mxu1 %v2482_v8 }
 0x9a0   : >> { %v2317_v32 = vpop.eup %2316 }
 0x9a1   : >> { %v1413_v27 = vmul.f32 %v2317_v32, %v2315_v15 }
 0x9a3   : >> { %v1414_v28 = vpack.c.bf16 %v1413_v27, %v1413_v27 }
 0x9a5   : >> { %2165 = vmatmul.mubr.msk.bf16.vlgmr.msra.gmra.mrb[24].mxu1 %vm875_vm3, %v1414_v28 }
 0x9a6   : >> { %2178 = vmatprep.mubr.msk.bf16.mxu1 %vm2483_vm2, %v2482_v8  ;;  %2175 = vmatpush3.bf16.msra.mxu1 %v2294_v47 }
 0x9a7   : >> { %2176 = vmatprep.subr.bf16.mxu1 %v2482_v8 }
 0x9aa   : >> { %2177 = vmatpush3.bf16.msra.mxu1 %v2295_v48 }
 0xa78   : >> { %v1457_v29 = vpop.f32.mrb[24].mxu1 }
 0xa79   : >> { %v1463_v30 = vpack.c.bf16 %v1457_v29, %v1457_v29  ;;  %v2166_v31 = vpop.f32.mrb[25].mxu1 }
 0xa7a   : >> { %v1460_v33 = vpop.f32.mrb[26].mxu1 }
 0xa7b   : >> { %v2167_v35 = vpop.f32.mrb[27].mxu1  ;;  %2171 = vmatmul.mubr.msk.bf16.vlgmr.msra.gmra.mrb[20].mxu0 %vm875_vm3, %v1463_v30 }
 0xa7c   : >> { %2190 = vmatprep.mubr.msk.bf16.mxu0 %vm2483_vm2, %v2482_v8  ;;  %2183 = vmatpush3.bf16.msra.mxu0 %v2296_v63 }
 0xa7d   : >> { %2184 = vmatprep.subr.bf16.mxu0 %v2482_v8 }
 0xa80   : >> { %2185 = vmatpush3.bf16.msra.mxu0 %v2297_v0 }
 0xa81   : >> { %2186 = vmatprep.subr.bf16.mxu0 %v2482_v8 }
 0xa84   : >> { %2187 = vmatpush3.bf16.msra.mxu0 %v2298_v1 }
 0xa85   : >> { %2188 = vmatprep.subr.bf16.mxu0 %v2482_v8 }
 0xa88   : >> { %2189 = vmatpush3.bf16.msra.mxu0 %v2299_v4 }
 0xb4e   : >> { %v1505_v36 = vpop.f32.mrb[20].mxu0 }
 0xb4f   : >> { %v1511_v37 = vadd.f32 %v1505_v36, %v1351_v20  ;;  %v2172_v38 = vpop.f32.mrb[21].mxu0 }
 0xb50   : >> { %v1508_v40 = vpop.f32.mrb[22].mxu0 }
 0xb51   : >> { %v1512_v41 = vadd.f32 %v1511_v37, %v2788_v3  ;;  %v2173_v42 = vpop.f32.mrb[23].mxu0 }
 0xb52   : >> { %v2042_v42 = vld [vmem:[%s740_s22] ss:$0 sm:$0xff] }
 0xb53   : >> { %v2925_v43 = vadd.f32 %v2034_v39, %v1512_v41 }
 0xb55   : >> { %v1523_v44 = vsel %vm764_vm1, %v2925_v43, 0.0  ;;  %v1527_v45 = vmul.f32 %v2925_v43, %v2925_v43 }
 0xb56   : >> { %1524 = vadd.xlane.f32.xlu1 %v1523_v44 }
 0xb57   : >> { %v1528_v46 = vsel %vm764_vm1, %v1527_v45, 0.0 }
 0xb5a   : >> { %1529 = vadd.xlane.f32.xlu1 %v1528_v46 }
 0xbe3   : >> { %v1525_v3 = vpop.xlane.xlu1 %1524 }
 0xbe4   : >> { %v1526_v49 = vmul.f32 0.03125, %v1525_v3 }
 0xbe6   : >> { %v1532_v51 = vmul.f32 %v1526_v49, %v1526_v49  ;;  %v1535_v55 = vsub.f32 %v2925_v43, %v1526_v49 }
 0xbe7   : >> { %v1530_v50 = vpop.xlane.xlu1 %1529 }
 0xbe8   : >> { %v1531_v52 = vmul.f32 0.03125, %v1530_v50 }
 0xbea   : >> { %v1533_v53 = vsub.f32 %v1531_v52, %v1532_v51 }
 0xbec   : >> { %v1534_v54 = vmax.f32 %v1533_v53, 0.0 }
 0xbee   : >> { %v1536_v34 = vadd.f32 1e-06, %v1534_v54 }
 0xbf0   : >> { %2318 = vrsqrt.f32 %v1536_v34 }
 0xbfa   : >> { %v2319_v56 = vpop.eup %2318 }
 0xbfb   : >> { %v1538_v58 = vmul.f32 %v2319_v56, %v1535_v55 }
 0xbfd   : >> { %v1545_v60 = vmul.f32 %v2035_v57, %v1538_v58 }
 0xbff   : >> { %v1552_v61 = vadd.f32 %v2036_v59, %v1545_v60 }
 0xc01   : >> { %v1553_v62 = vpack.c.bf16 %v1552_v61, %v1552_v61 }
 0xc03   : >> { %2179 = vmatmul.mubr.msk.bf16.vlgmr.msra.gmra.mrb[28].mxu1 %vm764_vm1, %v1553_v62 }
 0xcd6   : >> { %v1614_v6 = vpop.f32.mrb[28].mxu1 }
 0xcd7   : >> { %v1615_v7 = vadd.f32 %v2037_v5, %v1614_v6  ;;  %v2180_v9 = vpop.f32.mrb[29].mxu1 }
 0xcd8   : >> { %v1617_v10 = vpop.f32.mrb[30].mxu1 }
 0xcd9   : >> { %v1621_v11 = vmul.f32 0.70710677, %v1615_v7  ;;  %v2181_v12 = vpop.f32.mrb[31].mxu1  ;;  %v1620_v38 = vmul.f32 0.5, %v1615_v7 }
 0xcdb   : >> { %v2041_v13 = vclamps-f32 %v1621_v11, 4.0 }
 0xcdd   : >> { %v1624_v14 = vmul.f32 %v2041_v13, %v2041_v13 }
 0xcdf   : >> { %v1625_v15 = vmul.f32 -2.7261424e-10, %v1624_v14  ;;  %v1637_v16 = vmul.f32 -1.45660715e-05, %v1624_v14 }
 0xce1   : >> { %v1626_v17 = vadd.f32 2.7706815e-08, %v1625_v15  ;;  %v1638_v18 = vadd.f32 -0.00021337405, %v1637_v16 }
 0xce3   : >> { %v1627_v19 = vmul.f32 %v1626_v17, %v1624_v14  ;;  %v1639_v20 = vmul.f32 %v1638_v18, %v1624_v14 }
 0xce5   : >> { %v1628_v21 = vadd.f32 -2.101024e-06, %v1627_v19  ;;  %v1640_v22 = vadd.f32 -0.001682827, %v1639_v20 }
 0xce7   : >> { %v1629_v8 = vmul.f32 %v1628_v21, %v1624_v14  ;;  %v1641_v23 = vmul.f32 %v1640_v22, %v1624_v14 }
 0xce9   : >> { %v1630_v24 = vadd.f32 -5.6925062e-05, %v1629_v8  ;;  %v1642_v25 = vadd.f32 -0.0073733293, %v1641_v23 }
 0xceb   : >> { %v1631_v26 = vmul.f32 %v1630_v24, %v1624_v14  ;;  %v1643_v32 = vmul.f32 %v1642_v25, %v1624_v14 }
 0xced   : >> { %v1632_v27 = vadd.f32 -0.00073499064, %v1631_v26  ;;  %v1644_v28 = vadd.f32 -0.014264739, %v1643_v32 }
 0xcef   : >> { %v1633_v29 = vmul.f32 %v1632_v27, %v1624_v14  ;;  %2320 = vrcp.f32 %v1644_v28 }
 0xcf1   : >> { %v1634_v30 = vadd.f32 -0.0029546001, %v1633_v29 }
 0xcf3   : >> { %v1635_v31 = vmul.f32 %v1634_v30, %v1624_v14 }
 0xcf5   : >> { %v1636_v33 = vadd.f32 -0.016096033, %v1635_v31 }
 0xcf7   : >> { %v1645_v35 = vmul.f32 %v2041_v13, %v1636_v33 }
 0xcf9   : >> { %v2321_v36 = vpop.eup %2320 }
 0xcfa   : >> { %v1647_v37 = vmul.f32 %v2321_v36, %v1645_v35 }
 0xcfc   : >> { %v1648_v39 = vadd.f32 1.0, %v1647_v37 }
 0xcfe   : >> { %v1649_v40 = vmul.f32 %v1648_v39, %v1620_v38 }
 0xd00   : >> { %v1650_v41 = vpack.c.bf16 %v1649_v40, %v1649_v40 }
 0xd02   : >> { %2191 = vmatmul.mubr.msk.bf16.vlgmr.msra.gmra.mrb[24].mxu0 %vm1690_vm5, %v1650_v41 }
 0xdd4   : > { %757 = sbr.rel (!%p755_p1) target bundleno = 124 (0x7c), region = 177 }
 0xdd5   : >> { %v1728_v44 = vpop.f32.mrb[24].mxu0 }
 0xdd6   : >> { %v1729_v45 = vadd.f32 %v2042_v42, %v1728_v44  ;;  %v2192_v46 = vpop.f32.mrb[25].mxu0 }
 0xdd7   : >> { %v1731_v47 = vpop.f32.mrb[26].mxu0 }
 0xdd8   : >> { %v1734_v48 = vadd.f32 %v1729_v45, %v2925_v43  ;;  %v2193_v3 = vpop.f32.mrb[27].mxu0 }
 0xdda   : >> { %1735 = vst.msk [vmem:[%s2785_s28] sm:$0xff] %vm764_vm1, %v1734_v48 }
 0xddb   : > { %1739 = sbr.rel (%p2048_p5) target bundleno = 3729 (0xe91), region = 107  ;;  %s3093_s24 = sld [smem:[#allocation25_spill]] (!%p2048_p5) }
 0xddc   : > { %s3094_s30 = sld [smem:[#allocation26_spill]] (!%p2048_p5) }
 0xde1   : > { %v1740_v49 = vld [vmem:[#allocation7] sm:$0xff] (!%p2048_p5)  ;;  %v1741_v50 = vld [vmem:[#allocation7 + $0x8] sm:$0xff] (!%p2048_p5) }
 0xde2   : > { %v1745_v51 = vsel %vm764_vm1, %v1740_v49, 0.0  ;;  %v1754_v52 = vmul.f32 %v1740_v49, %v1740_v49  ;;  %v1755_v53 = vmul.f32 %v1741_v50, %v1741_v50  ;;  %v1748_v54 = vsel %vm764_vm1, %v1741_v50, 0.0  ;;  %v2049_v11 = vld [vmem:[%s3093_s24] ss:$0 sm:$0xff] }
 0xde3   : > { %1746 = vadd.xlane.f32.xlu0 %v1745_v51  ;;  %v2050_v13 = vld [vmem:[%s3094_s30] ss:$0 sm:$0xff] }
 0xde4   : > { %v1756_v43 = vsel %vm764_vm1, %v1754_v52, 0.0  ;;  %v1759_v34 = vsel %vm764_vm1, %v1755_v53, 0.0 }
 0xde5   : > { %1757 = vadd.xlane.f32.xlu1 %v1756_v43 }
 0xde7   : > { %1749 = vadd.xlane.f32.xlu0 %v1748_v54 }
 0xde9   : > { %1760 = vadd.xlane.f32.xlu1 %v1759_v34 }
 0xe70   : > { %v1747_v55 = vpop.xlane.xlu0 %1746 }
 0xe71   : > { %v1752_v2 = vmul.f32 0.03125, %v1747_v55 }
 0xe72   : > { %v1758_v56 = vpop.xlane.xlu1 %1757 }
 0xe73   : > { %v1764_v57 = vmul.f32 %v1752_v2, %v1752_v2  ;;  %v1762_v58 = vmul.f32 0.03125, %v1758_v56  ;;  %v1770_v9 = vsub.f32 %v1740_v49, %v1752_v2 }
 0xe74   : > { %v1750_v59 = vpop.xlane.xlu0 %1749 }
 0xe75   : > { %v1766_v60 = vsub.f32 %v1762_v58, %v1764_v57  ;;  %v1753_v61 = vmul.f32 0.03125, %v1750_v59 }
 0xe76   : > { %v1761_v62 = vpop.xlane.xlu1 %1760 }
 0xe77   : > { %v1768_v63 = vmax.f32 %v1766_v60, 0.0  ;;  %v1765_v0 = vmul.f32 %v1753_v61, %v1753_v61  ;;  %v1763_v1 = vmul.f32 0.03125, %v1761_v62  ;;  %v1771_v15 = vsub.f32 %v1741_v50, %v1753_v61 }
 0xe79   : > { %v1772_v4 = vadd.f32 1e-06, %v1768_v63  ;;  %v1767_v5 = vsub.f32 %v1763_v1, %v1765_v0 }
 0xe7b   : > { %2322 = vrsqrt.f32 %v1772_v4  ;;  %v1769_v6 = vmax.f32 %v1767_v5, 0.0 }
 0xe7d   : > { %v1773_v7 = vadd.f32 1e-06, %v1769_v6 }
 0xe7f   : > { %2324 = vrsqrt.f32 %v1773_v7 }
 0xe85   : > { %v2323_v10 = vpop.eup %2322 }
 0xe86   : > { %v1776_v12 = vmul.f32 %v2323_v10, %v1770_v9 }
 0xe88   : > { %v1784_v14 = vmul.f32 %v2049_v11, %v1776_v12 }
 0xe89   : > { %v2325_v16 = vpop.eup %2324 }
 0xe8a   : > { %v1792_v17 = vadd.f32 %v2050_v13, %v1784_v14  ;;  %v1777_v18 = vmul.f32 %v2325_v16, %v1771_v15 }
 0xe8c   : > { %1794 = vst.msk [vmem:[#allocation7] sm:$0xff] %vm764_vm1, %v1792_v17  ;;  %v1785_v19 = vmul.f32 %v2049_v11, %v1777_v18 }
 0xe8e   : > { %v1793_v20 = vadd.f32 %v2050_v13, %v1785_v19 }
 0xe90   : > { %1795 = vst.msk [vmem:[#allocation7 + $0x8] sm:$0xff] %vm764_vm1, %v1793_v20 }
 0xe91 PF: > { %s3095_s21 = sld [smem:[#allocation14_spill]]  ;;  %s2495_s0 = smov [#allocation7]  }
 0xe92   : > { %s1805_s25 = sshll.u32 %s2495_s0, 4  ;;  %s1806_s25 = int_to_ptr.vmem [resolvable:$true] %s1805_s25 }
 0xe93   : > { %s2384_s28 = scalar_lea.vmem %s1806_s25, 256  ;;  %p2391_p13 = scmp.lt.s32.totalorder %s1806_s25, %s1806_s25 }
 0xe94   : > { %p2385_p9 = scmp.ne.s32.totalorder %s1806_s25, %s2384_s28  ;;  %p2392_p2 = scmp.lt.s32.totalorder %s2384_s28, %s2384_s28 }
 0xe96   : > { %p2393_p3 = por %p2392_p2, %p2391_p13 }
 0xe97   : > { %s3096_s18 = sadd.s32 4294967295, %s3095_s21  }
 0xe98   : > { %p2981_p8 = scmp.eq.s32.totalorder %s3096_s18, 1 }
 0xe9a   : > { %p2386_p10 = pnand %p2385_p9, %p2981_p8 }
 0xe9c   : > { %p2387_p11 = pneg %p2386_p10 }
 0xe9e   : > { %p2394_p0 = pnand %p2393_p3, %p2387_p11 }
 0xea0   : > { %2397 = shalt.err (!%p2394_p0)
}
 0xea1   : > { %s3098_s19 = sld [smem:[#allocation27_spill]] }
 0xea7   : > { %s2398_s15 = scalar_lea.hbm %s3098_s19, 256 }
 0xea8   : > { %p2399_p12 = scmp.ne.s32.totalorder %s3098_s19, %s2398_s15  ;;  %p2404_p4 = scmp.lt.u32.totalorder %s2398_s15, %s3098_s19 }
 0xeaa   : > { %p2400_p6 = pnand %p2399_p12, %p2981_p8 }
 0xeac   : > { %p2401_p7 = pneg %p2400_p6 }
 0xeae   : > { %p2406_p1 = pnand %p2404_p4, %p2401_p7 }
 0xeb0   : > { %2409 = shalt.err (!%p2406_p1)
}
 0xeb1   : > { %s2496_s11 = smov 128   ;;  %s2497_s29 = smov 8  }
 0xeb2   : > { %2201 = dma.vmem_to_hbm [thread:$0]  (%p2981_p8), %s1806_s25, 256, %s3098_s19, [#allocation4], %s2496_s11, %s2496_s11, %s2497_s29  }
 0xeb3   : > { %2447 = dma.done.wait (%p2981_p8), [#allocation4], 256  }
 0xeb4   : > { %2449 = vsyncadd (%p2981_p8), [#allocation4], 4294967040 }
 0xeb5 PF: > { %s3099_s10 = sld [smem:[#allocation14_spill]]  ;;  %s3100_s21 = sld [smem:[#allocation11_spill]] }
 0xeb6   : > { %s3101_s22 = sld [smem:[#allocation12_spill]]  ;;  %s3102_s23 = sld [smem:[#allocation16_spill]] }
 0xeb7   : > { %s3103_s24 = sld [smem:[#allocation13_spill]]  ;;  %s3104_s25 = sld [smem:[#allocation15_spill]] }
 0xebb   : > { %s31_s26 = sadd.s32 1, %s3099_s10  }
 0xebc   : > { %p28_p5 = scmp.ge.s32.totalorder %s31_s26, 4  }
 0xebe   :  { %30 = sbr.rel (!%p28_p5) target bundleno = 18 (0x12), region = 188 }
 0xec5   :  { %1821 = vsyncpa [#allocation3], 1 }
 0xec6   :  { %1823 = vsyncpa [#allocation3 + $0x1], 1 }
 0xec7   :  { %1824 = vsyncpa [#allocation6], 1 }
 0xec8   :  { %1826 = vsyncpa [#allocation6 + $0x1], 1 }
 0xec9   :  { %1827 = vsyncpa [#allocation4], 1 }
 0xeca   :  { %1829 = vsyncpa [#allocation4 + $0x1], 1 }

</bundles_post_ra>
